<compile_context>
chip_gen: v6e
topology: v6e:2x2x1
jax: 0.10.0
libtpu: 0.0.40
codegen_flags: <defaults>
</compile_context>

<pallas_src>
import math
import functools

import jax
import jax.numpy as jnp
from jax.experimental import pallas as pl
from jax.experimental.pallas import tpu as pltpu


def _layer_norm(y, gamma, beta, eps=1e-12):
    # PyTorch nn.LayerNorm: biased variance over last dim, eps inside sqrt. fp32 math.
    mu = jnp.mean(y, axis=-1, keepdims=True)
    var = jnp.mean((y - mu) ** 2, axis=-1, keepdims=True)
    return (y - mu) * jax.lax.rsqrt(var + eps) * gamma + beta


def bert_layer_kernel(num_heads, i_chunk,
                      x_ref, mask_ref,
                      wq_ref, bq_ref, wkv_ref, bkv_ref,
                      wo_ref, bo_ref, g1_ref, be1_ref,
                      wi_ref, bi_ref, w2_ref, b2_ref, g2_ref, be2_ref,
                      out_ref,
                      k_cache, v_cache):
    f32, bf16 = jnp.float32, jnp.bfloat16
    S, H = x_ref.shape[1], x_ref.shape[2]
    tS = out_ref.shape[1]
    hd = H // num_heads

    # ---- K/V cache fill: once per batch row (query-tile index 0) ------------------
    # One fused full-width (S,H)@(H,2H) matmul, then split heads into bf16 scratch.
    @pl.when(pl.program_id(1) == 0)
    def _():
        xs_b = x_ref[0].astype(bf16)                                        # (S, H)
        kv = jnp.dot(xs_b, wkv_ref[...], preferred_element_type=f32) + bkv_ref[0]
        kv = kv.astype(bf16)                                                # (S, 2H)
        for h in range(num_heads):                                          # static
            k_cache[h] = kv[:, h * hd:(h + 1) * hd]
            v_cache[h] = kv[:, H + h * hd:H + (h + 1) * hd]

    # ---- query tile: slice of the resident full-sequence block --------------------
    qstart = pl.multiple_of(pl.program_id(1) * tS, tS)
    xq = x_ref[0, pl.ds(qstart, tS), :].astype(f32)                         # (tS, H)
    mask = mask_ref[0].astype(f32)                                          # (1, S)

    # ---- Q projection: full-width matmul, 1/sqrt(hd) pre-folded into wq/bq --------
    q2 = jnp.dot(xq.astype(bf16), wq_ref[...], preferred_element_type=f32) + bq_ref[0]
    q2b = q2.astype(bf16)                                                   # (tS, H)
    q_h = jnp.stack([q2b[:, h * hd:(h + 1) * hd] for h in range(num_heads)],
                    axis=0)                                                 # (n, tS, hd)

    # ---- scores / softmax (fp32 stats) / context -----------------------------------
    s = jnp.einsum('nqd,nkd->nqk', q_h, k_cache[...],
                   preferred_element_type=f32)                              # (n, tS, S)
    s = s + mask                                                            # broadcast
    s = s - jnp.max(s, axis=-1, keepdims=True)
    p = jnp.exp(s)
    p = p * pl.reciprocal(jnp.sum(p, axis=-1, keepdims=True), approx=True)
    # attention dropout is identity in eval mode
    ctx = jnp.einsum('nqk,nkd->nqd', p.astype(bf16), v_cache[...],
                     preferred_element_type=f32)                            # (n, tS, hd)

    # ---- BertSelfOutput: merge heads (lane concat) + one full-depth matmul --------
    ctx_b = ctx.astype(bf16)
    ctx2 = jnp.concatenate([ctx_b[h] for h in range(num_heads)], axis=-1)   # (tS, H)
    attn = jnp.dot(ctx2, wo_ref[...], preferred_element_type=f32) + bo_ref[0]
    h1 = _layer_norm(attn + xq, g1_ref[0], be1_ref[0])                      # fp32

    # ---- BertIntermediate + BertOutput, chunked over the intermediate dim ---------
    h1_b = h1.astype(bf16)
    I = wi_ref.shape[1]
    n_chunks = I // i_chunk

    def gelu(z):  # exact erf GELU, fp32
        return 0.5 * z * (1.0 + jax.lax.erf(z * (1.0 / math.sqrt(2.0))))

    if n_chunks == 1:
        inter = gelu(jnp.dot(h1_b, wi_ref[...], preferred_element_type=f32) + bi_ref[0])
        out = jnp.dot(inter.astype(bf16), w2_ref[...], preferred_element_type=f32)
    else:
        def ffn_chunk(c, acc):
            lo = pl.multiple_of(c * i_chunk, i_chunk)
            inter = gelu(jnp.dot(h1_b, wi_ref[:, pl.ds(lo, i_chunk)],
                                 preferred_element_type=f32)
                         + bi_ref[0, pl.ds(lo, i_chunk)])
            return acc + jnp.dot(inter.astype(bf16), w2_ref[pl.ds(lo, i_chunk), :],
                                 preferred_element_type=f32)
        out = jax.lax.fori_loop(0, n_chunks, ffn_chunk,
                                jnp.zeros((tS, H), f32), unroll=True)

    out = out + b2_ref[0]
    out = _layer_norm(out + h1, g2_ref[0], be2_ref[0])
    out_ref[0] = out.astype(out_ref.dtype)


def _pick_tile(n, candidates):
    for c in candidates:
        if n >= c and n % c == 0:
            return c
    return n


def _vmem_capacity_bytes():
    try:
        return int(pltpu.get_tpu_info().vmem_capacity_bytes)
    except Exception:
        return 128 * 1024 * 1024


def _vmem_limit_bytes():
    cap = _vmem_capacity_bytes()
    return int(max(32 * 1024 * 1024, min(cap * 3 // 4, 100 * 1024 * 1024)))


def _pick_qtile(S):
    if S <= 256:
        return S
    cands = (256, 128)
    # v7x (64 MiB VMEM/TC): shrink the query tile for long sequences.
    if _vmem_capacity_bytes() <= (64 << 20) and S >= 1024:
        cands = (128, 256)
    for c in cands:
        if S % c == 0:
            return c
    return S


def prepare_layer_params(params, num_heads):
    """Host-side prep: fold 1/sqrt(hd) into wq/bq, fuse K|V weights, cast to bf16."""
    H = params["wq"].shape[0]
    hd = H // num_heads
    inv = 1.0 / math.sqrt(hd)
    bf16, f32 = jnp.bfloat16, jnp.float32
    return {
        "wq": (params["wq"] * inv).astype(bf16),
        "bq": (params["bq"] * inv).astype(f32),
        "wkv": jnp.concatenate([params["wk"], params["wv"]], axis=1).astype(bf16),
        "bkv": jnp.concatenate([params["bk"], params["bv"]], axis=1).astype(f32),
        "wo": params["wo"].astype(bf16),
        "bo": params["bo"].astype(f32),
        "ln1_g": params["ln1_g"].astype(f32), "ln1_b": params["ln1_b"].astype(f32),
        "wi": params["wi"].astype(bf16), "bi": params["bi"].astype(f32),
        "w2": params["w2"].astype(bf16), "b2": params["b2"].astype(f32),
        "ln2_g": params["ln2_g"].astype(f32), "ln2_b": params["ln2_b"].astype(f32),
    }


def bert_layer(x, mask, lp, num_heads, out_dtype=jnp.bfloat16):
    B, S, H = x.shape
    I = lp["wi"].shape[1]
    hd = H // num_heads

    tS = _pick_qtile(S)
    nq = S // tS
    i_chunk = _pick_tile(I, (1024, 512))

    # Un-blocked VMEM specs: whole weight resident once, not double-buffered.
    wspec = pl.BlockSpec(memory_space=pltpu.MemorySpace.VMEM)
    in_specs = [
        pl.BlockSpec((1, S, H), lambda b, q: (b, 0, 0)),   # x: full seq, fetched once/b
        pl.BlockSpec((1, 1, S), lambda b, q: (b, 0, 0)),   # additive attention mask
    ] + [wspec] * 14
    out_spec = pl.BlockSpec((1, tS, H), lambda b, q: (b, q, 0))

    flops = int(8 * B * S * H * H + 4 * B * S * S * H + 4 * B * S * H * I)
    transc = int(B * num_heads * S * S + B * S * I)
    bytes_acc = int(B * S * H * (x.dtype.itemsize + jnp.dtype(out_dtype).itemsize)
                    + B * S * 4 + (4 * H * H + 2 * H * I) * 2 + (I + 9 * H) * 4)

    kernel = functools.partial(bert_layer_kernel, num_heads, i_chunk)
    return pl.pallas_call(
        kernel,
        out_shape=jax.ShapeDtypeStruct((B, S, H), out_dtype),
        grid_spec=pltpu.PrefetchScalarGridSpec(
            num_scalar_prefetch=0,
            grid=(B, nq),
            in_specs=in_specs,
            out_specs=out_spec,
            scratch_shapes=[pltpu.VMEM((num_heads, S, hd), jnp.bfloat16),   # K cache
                            pltpu.VMEM((num_heads, S, hd), jnp.bfloat16)], # V cache
        ),
        compiler_params=pltpu.CompilerParams(
            dimension_semantics=("parallel", "arbitrary"),
            vmem_limit_bytes=_vmem_limit_bytes(),
        ),
        cost_estimate=pl.CostEstimate(flops=flops, transcendentals=transc,
                                      bytes_accessed=bytes_acc),
    )(x, mask,
      lp["wq"], lp["bq"], lp["wkv"], lp["bkv"],
      lp["wo"], lp["bo"], lp["ln1_g"], lp["ln1_b"],
      lp["wi"], lp["bi"], lp["w2"], lp["b2"],
      lp["ln2_g"], lp["ln2_b"])


def bert_encoder(hidden_states, attention_mask, params, num_layers, num_heads,
                 output_all_encoded_layers=True, interlayer_dtype=jnp.bfloat16):
    lp = prepare_layer_params(params, num_heads)   # one-time host-side prep
    all_encoder_layers = []
    h = hidden_states
    for _ in range(num_layers):
        h = bert_layer(h, attention_mask, lp, num_heads, out_dtype=interlayer_dtype)
        if output_all_encoded_layers:
            all_encoder_layers.append(h)
    if not output_all_encoded_layers:
        all_encoder_layers.append(h)
    return all_encoder_layers


def init_params(key, H, I):
    # nn.Linear weights pre-transposed to (in, out) so the kernel does x @ W + b.
    std = 0.02
    ks = jax.random.split(key, 12)
    f32 = jnp.float32
    return {
        "wq": jax.random.normal(ks[0], (H, H), f32) * std,
        "bq": jax.random.normal(ks[1], (1, H), f32) * std,
        "wk": jax.random.normal(ks[2], (H, H), f32) * std,
        "bk": jax.random.normal(ks[3], (1, H), f32) * std,
        "wv": jax.random.normal(ks[4], (H, H), f32) * std,
        "bv": jax.random.normal(ks[5], (1, H), f32) * std,
        "wo": jax.random.normal(ks[6], (H, H), f32) * std,
        "bo": jax.random.normal(ks[7], (1, H), f32) * std,
        "ln1_g": jnp.ones((1, H), f32),
        "ln1_b": jnp.zeros((1, H), f32),
        "wi": jax.random.normal(ks[8], (H, I), f32) * std,
        "bi": jax.random.normal(ks[9], (1, I), f32) * std,
        "w2": jax.random.normal(ks[10], (I, H), f32) * std,
        "b2": jax.random.normal(ks[11], (1, H), f32) * std,
        "ln2_g": jnp.ones((1, H), f32),
        "ln2_b": jnp.zeros((1, H), f32),
    }


if __name__ == "__main__":
    B, S, H = 2, 8, 32
    NUM_HEADS, INTERMEDIATE, NUM_LAYERS = 4, 64, 2

    key = jax.random.PRNGKey(0)
    kx, kp = jax.random.split(key, 2)

    hidden_states = jax.random.normal(kx, (B, S, H), jnp.float32)

    # Additive attention mask: 0 for attended positions, -10000 for masked.
    lengths = jnp.array([S, S - 2])
    pos = jnp.arange(S)[None, :]
    attention_mask = jnp.where(pos < lengths[:, None], 0.0, -10000.0)
    attention_mask = attention_mask.astype(jnp.float32)[:, None, :]   # (B, 1, S)

    params = init_params(kp, H, INTERMEDIATE)

    all_layers = bert_encoder(hidden_states, attention_mask, params,
                              num_layers=NUM_LAYERS, num_heads=NUM_HEADS,
                              output_all_encoded_layers=True)
    all_layers = jax.block_until_ready(all_layers)
    print("KERNEL_OK")
</pallas_src>

<mosaic_0001>
module attributes {stable_mosaic.version = 11 : i64} {
  func.func @bert_layer_kernel(%arg0: i32, %arg1: i32, %arg2: memref<1x8x32xf32, #tpu.memory_space<vmem>>, %arg3: memref<1x1x8xf32, #tpu.memory_space<vmem>>, %arg4: memref<32x32xbf16, #tpu.memory_space<vmem>>, %arg5: memref<1x32xf32, #tpu.memory_space<vmem>>, %arg6: memref<32x64xbf16, #tpu.memory_space<vmem>>, %arg7: memref<1x64xf32, #tpu.memory_space<vmem>>, %arg8: memref<32x32xbf16, #tpu.memory_space<vmem>>, %arg9: memref<1x32xf32, #tpu.memory_space<vmem>>, %arg10: memref<1x32xf32, #tpu.memory_space<vmem>>, %arg11: memref<1x32xf32, #tpu.memory_space<vmem>>, %arg12: memref<32x64xbf16, #tpu.memory_space<vmem>>, %arg13: memref<1x64xf32, #tpu.memory_space<vmem>>, %arg14: memref<64x32xbf16, #tpu.memory_space<vmem>>, %arg15: memref<1x32xf32, #tpu.memory_space<vmem>>, %arg16: memref<1x32xf32, #tpu.memory_space<vmem>>, %arg17: memref<1x32xf32, #tpu.memory_space<vmem>>, %arg18: memref<1x8x32xbf16, #tpu.memory_space<vmem>>, %arg19: memref<4x8x8xbf16, #tpu.memory_space<vmem>>, %arg20: memref<4x8x8xbf16, #tpu.memory_space<vmem>>) attributes {dimension_semantics = [#tpu.dimension_semantics<parallel>, #tpu.dimension_semantics<arbitrary>], iteration_bounds = array<i64: 2, 1>, scalar_prefetch = 0 : i64, scratch_operands = 2 : i64, tpu.core_type = #tpu.core_type<tc>, window_params = [{transform_indices = @transform_0, window_bounds = array<i64: 1, 8, 32>}, {transform_indices = @transform_1, window_bounds = array<i64: 1, 1, 8>}, {pipeline_mode = #tpu.pipeline_mode<synchronous>, transform_indices = @transform_2, window_bounds = array<i64: 32, 32>}, {pipeline_mode = #tpu.pipeline_mode<synchronous>, transform_indices = @transform_3, window_bounds = array<i64: 1, 32>}, {pipeline_mode = #tpu.pipeline_mode<synchronous>, transform_indices = @transform_4, window_bounds = array<i64: 32, 64>}, {pipeline_mode = #tpu.pipeline_mode<synchronous>, transform_indices = @transform_5, window_bounds = array<i64: 1, 64>}, {pipeline_mode = #tpu.pipeline_mode<synchronous>, transform_indices = @transform_6, window_bounds = array<i64: 32, 32>}, {pipeline_mode = #tpu.pipeline_mode<synchronous>, transform_indices = @transform_7, window_bounds = array<i64: 1, 32>}, {pipeline_mode = #tpu.pipeline_mode<synchronous>, transform_indices = @transform_8, window_bounds = array<i64: 1, 32>}, {pipeline_mode = #tpu.pipeline_mode<synchronous>, transform_indices = @transform_9, window_bounds = array<i64: 1, 32>}, {pipeline_mode = #tpu.pipeline_mode<synchronous>, transform_indices = @transform_10, window_bounds = array<i64: 32, 64>}, {pipeline_mode = #tpu.pipeline_mode<synchronous>, transform_indices = @transform_11, window_bounds = array<i64: 1, 64>}, {pipeline_mode = #tpu.pipeline_mode<synchronous>, transform_indices = @transform_12, window_bounds = array<i64: 64, 32>}, {pipeline_mode = #tpu.pipeline_mode<synchronous>, transform_indices = @transform_13, window_bounds = array<i64: 1, 32>}, {pipeline_mode = #tpu.pipeline_mode<synchronous>, transform_indices = @transform_14, window_bounds = array<i64: 1, 32>}, {pipeline_mode = #tpu.pipeline_mode<synchronous>, transform_indices = @transform_15, window_bounds = array<i64: 1, 32>}, {transform_indices = @transform_16, window_bounds = array<i64: 1, 8, 32>}]} {
    %c0_i32 = arith.constant 0 : i32
    %0 = arith.cmpi eq, %arg1, %c0_i32 : i32
    %1 = arith.extui %0 : i1 to i32
    %c0_i32_0 = arith.constant 0 : i32
    %2 = arith.cmpi ne, %1, %c0_i32_0 : i32
    scf.if %2 {
      %c0_58 = arith.constant 0 : index
      %c0_59 = arith.constant 0 : index
      %c0_60 = arith.constant 0 : index
      %149 = vector.load %arg2[%c0_58, %c0_59, %c0_60] : memref<1x8x32xf32, #tpu.memory_space<vmem>>, vector<1x8x32xf32>
      %150 = vector.shape_cast %149 : vector<1x8x32xf32> to vector<8x32xf32>
      %151 = arith.truncf %150 : vector<8x32xf32> to vector<8x32xbf16>
      %c0_61 = arith.constant 0 : index
      %c0_62 = arith.constant 0 : index
      %152 = vector.load %arg6[%c0_61, %c0_62] : memref<32x64xbf16, #tpu.memory_space<vmem>>, vector<32x64xbf16>
      %cst_63 = arith.constant dense<0.000000e+00> : vector<8x64xf32>
      %153 = tpu.matmul %151, %152, %cst_63 {dimension_numbers = #tpu.dot_dimension_numbers<[1], [0], [0], [1], [0, 0, 1, 1], [], []>} : vector<8x32xbf16>, vector<32x64xbf16>, vector<8x64xf32> -> vector<8x64xf32>
      %c0_64 = arith.constant 0 : index
      %c0_65 = arith.constant 0 : index
      %154 = vector.load %arg7[%c0_64, %c0_65] : memref<1x64xf32, #tpu.memory_space<vmem>>, vector<1x64xf32>
      %155 = vector.shape_cast %154 : vector<1x64xf32> to vector<64xf32>
      %156 = vector.shape_cast %155 : vector<64xf32> to vector<1x64xf32>
      %157 = vector.broadcast %156 : vector<1x64xf32> to vector<8x64xf32>
      %158 = arith.addf %153, %157 : vector<8x64xf32>
      %159 = arith.truncf %158 : vector<8x64xf32> to vector<8x64xbf16>
      %160 = vector.extract_strided_slice %159 {offsets = [0, 0], sizes = [8, 8], strides = [1, 1]} : vector<8x64xbf16> to vector<8x8xbf16>
      %c0_66 = arith.constant 0 : index
      %c0_67 = arith.constant 0 : index
      %c0_68 = arith.constant 0 : index
      %161 = vector.load %arg19[%c0_66, %c0_67, %c0_68] : memref<4x8x8xbf16, #tpu.memory_space<vmem>>, vector<1x8x8xbf16>
      %162 = vector.shape_cast %161 : vector<1x8x8xbf16> to vector<8x8xbf16>
      %163 = vector.shape_cast %160 : vector<8x8xbf16> to vector<1x8x8xbf16>
      tpu.vector_store %arg19[%c0_66, %c0_67, %c0_68], %163 {strides = array<i32>} : memref<4x8x8xbf16, #tpu.memory_space<vmem>>, vector<1x8x8xbf16>,
      %164 = vector.extract_strided_slice %159 {offsets = [0, 32], sizes = [8, 8], strides = [1, 1]} : vector<8x64xbf16> to vector<8x8xbf16>
      %c0_69 = arith.constant 0 : index
      %c0_70 = arith.constant 0 : index
      %c0_71 = arith.constant 0 : index
      %165 = vector.load %arg20[%c0_69, %c0_70, %c0_71] : memref<4x8x8xbf16, #tpu.memory_space<vmem>>, vector<1x8x8xbf16>
      %166 = vector.shape_cast %165 : vector<1x8x8xbf16> to vector<8x8xbf16>
      %167 = vector.shape_cast %164 : vector<8x8xbf16> to vector<1x8x8xbf16>
      tpu.vector_store %arg20[%c0_69, %c0_70, %c0_71], %167 {strides = array<i32>} : memref<4x8x8xbf16, #tpu.memory_space<vmem>>, vector<1x8x8xbf16>,
      %168 = vector.extract_strided_slice %159 {offsets = [0, 8], sizes = [8, 8], strides = [1, 1]} : vector<8x64xbf16> to vector<8x8xbf16>
      %c1 = arith.constant 1 : index
      %c0_72 = arith.constant 0 : index
      %c0_73 = arith.constant 0 : index
      %169 = vector.load %arg19[%c1, %c0_72, %c0_73] : memref<4x8x8xbf16, #tpu.memory_space<vmem>>, vector<1x8x8xbf16>
      %170 = vector.shape_cast %169 : vector<1x8x8xbf16> to vector<8x8xbf16>
      %171 = vector.shape_cast %168 : vector<8x8xbf16> to vector<1x8x8xbf16>
      tpu.vector_store %arg19[%c1, %c0_72, %c0_73], %171 {strides = array<i32>} : memref<4x8x8xbf16, #tpu.memory_space<vmem>>, vector<1x8x8xbf16>,
      %172 = vector.extract_strided_slice %159 {offsets = [0, 40], sizes = [8, 8], strides = [1, 1]} : vector<8x64xbf16> to vector<8x8xbf16>
      %c1_74 = arith.constant 1 : index
      %c0_75 = arith.constant 0 : index
      %c0_76 = arith.constant 0 : index
      %173 = vector.load %arg20[%c1_74, %c0_75, %c0_76] : memref<4x8x8xbf16, #tpu.memory_space<vmem>>, vector<1x8x8xbf16>
      %174 = vector.shape_cast %173 : vector<1x8x8xbf16> to vector<8x8xbf16>
      %175 = vector.shape_cast %172 : vector<8x8xbf16> to vector<1x8x8xbf16>
      tpu.vector_store %arg20[%c1_74, %c0_75, %c0_76], %175 {strides = array<i32>} : memref<4x8x8xbf16, #tpu.memory_space<vmem>>, vector<1x8x8xbf16>,
      %176 = vector.extract_strided_slice %159 {offsets = [0, 16], sizes = [8, 8], strides = [1, 1]} : vector<8x64xbf16> to vector<8x8xbf16>
      %c2 = arith.constant 2 : index
      %c0_77 = arith.constant 0 : index
      %c0_78 = arith.constant 0 : index
      %177 = vector.load %arg19[%c2, %c0_77, %c0_78] : memref<4x8x8xbf16, #tpu.memory_space<vmem>>, vector<1x8x8xbf16>
      %178 = vector.shape_cast %177 : vector<1x8x8xbf16> to vector<8x8xbf16>
      %179 = vector.shape_cast %176 : vector<8x8xbf16> to vector<1x8x8xbf16>
      tpu.vector_store %arg19[%c2, %c0_77, %c0_78], %179 {strides = array<i32>} : memref<4x8x8xbf16, #tpu.memory_space<vmem>>, vector<1x8x8xbf16>,
      %180 = vector.extract_strided_slice %159 {offsets = [0, 48], sizes = [8, 8], strides = [1, 1]} : vector<8x64xbf16> to vector<8x8xbf16>
      %c2_79 = arith.constant 2 : index
      %c0_80 = arith.constant 0 : index
      %c0_81 = arith.constant 0 : index
      %181 = vector.load %arg20[%c2_79, %c0_80, %c0_81] : memref<4x8x8xbf16, #tpu.memory_space<vmem>>, vector<1x8x8xbf16>
      %182 = vector.shape_cast %181 : vector<1x8x8xbf16> to vector<8x8xbf16>
      %183 = vector.shape_cast %180 : vector<8x8xbf16> to vector<1x8x8xbf16>
      tpu.vector_store %arg20[%c2_79, %c0_80, %c0_81], %183 {strides = array<i32>} : memref<4x8x8xbf16, #tpu.memory_space<vmem>>, vector<1x8x8xbf16>,
      %184 = vector.extract_strided_slice %159 {offsets = [0, 24], sizes = [8, 8], strides = [1, 1]} : vector<8x64xbf16> to vector<8x8xbf16>
      %c3 = arith.constant 3 : index
      %c0_82 = arith.constant 0 : index
      %c0_83 = arith.constant 0 : index
      %185 = vector.load %arg19[%c3, %c0_82, %c0_83] : memref<4x8x8xbf16, #tpu.memory_space<vmem>>, vector<1x8x8xbf16>
      %186 = vector.shape_cast %185 : vector<1x8x8xbf16> to vector<8x8xbf16>
      %187 = vector.shape_cast %184 : vector<8x8xbf16> to vector<1x8x8xbf16>
      tpu.vector_store %arg19[%c3, %c0_82, %c0_83], %187 {strides = array<i32>} : memref<4x8x8xbf16, #tpu.memory_space<vmem>>, vector<1x8x8xbf16>,
      %188 = vector.extract_strided_slice %159 {offsets = [0, 56], sizes = [8, 8], strides = [1, 1]} : vector<8x64xbf16> to vector<8x8xbf16>
      %c3_84 = arith.constant 3 : index
      %c0_85 = arith.constant 0 : index
      %c0_86 = arith.constant 0 : index
      %189 = vector.load %arg20[%c3_84, %c0_85, %c0_86] : memref<4x8x8xbf16, #tpu.memory_space<vmem>>, vector<1x8x8xbf16>
      %190 = vector.shape_cast %189 : vector<1x8x8xbf16> to vector<8x8xbf16>
      %191 = vector.shape_cast %188 : vector<8x8xbf16> to vector<1x8x8xbf16>
      tpu.vector_store %arg20[%c3_84, %c0_85, %c0_86], %191 {strides = array<i32>} : memref<4x8x8xbf16, #tpu.memory_space<vmem>>, vector<1x8x8xbf16>,
    } else {
    }
    %c8_i32 = arith.constant 8 : i32
    %3 = arith.muli %arg1, %c8_i32 : i32
    %4 = tpu.assume_multiple %3, 8 : i32
    %c0 = arith.constant 0 : index
    %5 = arith.index_cast %4 : i32 to index
    %c0_1 = arith.constant 0 : index
    %6 = vector.load %arg2[%c0, %5, %c0_1] : memref<1x8x32xf32, #tpu.memory_space<vmem>>, vector<1x8x32xf32>
    %7 = vector.shape_cast %6 : vector<1x8x32xf32> to vector<8x32xf32>
    %c0_2 = arith.constant 0 : index
    %c0_3 = arith.constant 0 : index
    %c0_4 = arith.constant 0 : index
    %8 = vector.load %arg3[%c0_2, %c0_3, %c0_4] : memref<1x1x8xf32, #tpu.memory_space<vmem>>, vector<1x1x8xf32>
    %9 = vector.shape_cast %8 : vector<1x1x8xf32> to vector<1x8xf32>
    %10 = arith.truncf %7 : vector<8x32xf32> to vector<8x32xbf16>
    %c0_5 = arith.constant 0 : index
    %c0_6 = arith.constant 0 : index
    %11 = vector.load %arg4[%c0_5, %c0_6] : memref<32x32xbf16, #tpu.memory_space<vmem>>, vector<32x32xbf16>
    %cst = arith.constant dense<0.000000e+00> : vector<8x32xf32>
    %12 = tpu.matmul %10, %11, %cst {dimension_numbers = #tpu.dot_dimension_numbers<[1], [0], [0], [1], [0, 0, 1, 1], [], []>} : vector<8x32xbf16>, vector<32x32xbf16>, vector<8x32xf32> -> vector<8x32xf32>
    %c0_7 = arith.constant 0 : index
    %c0_8 = arith.constant 0 : index
    %13 = vector.load %arg5[%c0_7, %c0_8] : memref<1x32xf32, #tpu.memory_space<vmem>>, vector<1x32xf32>
    %14 = vector.shape_cast %13 : vector<1x32xf32> to vector<32xf32>
    %15 = vector.shape_cast %14 : vector<32xf32> to vector<1x32xf32>
    %16 = vector.broadcast %15 : vector<1x32xf32> to vector<8x32xf32>
    %17 = arith.addf %12, %16 : vector<8x32xf32>
    %18 = arith.truncf %17 : vector<8x32xf32> to vector<8x32xbf16>
    %19 = vector.extract_strided_slice %18 {offsets = [0, 0], sizes = [8, 8], strides = [1, 1]} : vector<8x32xbf16> to vector<8x8xbf16>
    %20 = vector.extract_strided_slice %18 {offsets = [0, 8], sizes = [8, 8], strides = [1, 1]} : vector<8x32xbf16> to vector<8x8xbf16>
    %21 = vector.extract_strided_slice %18 {offsets = [0, 16], sizes = [8, 8], strides = [1, 1]} : vector<8x32xbf16> to vector<8x8xbf16>
    %22 = vector.extract_strided_slice %18 {offsets = [0, 24], sizes = [8, 8], strides = [1, 1]} : vector<8x32xbf16> to vector<8x8xbf16>
    %23 = vector.shape_cast %19 : vector<8x8xbf16> to vector<1x8x8xbf16>
    %24 = vector.shape_cast %20 : vector<8x8xbf16> to vector<1x8x8xbf16>
    %25 = vector.shape_cast %21 : vector<8x8xbf16> to vector<1x8x8xbf16>
    %26 = vector.shape_cast %22 : vector<8x8xbf16> to vector<1x8x8xbf16>
    %27 = tpu.concatenate %23, %24, %25, %26 in 0 : vector<1x8x8xbf16>, vector<1x8x8xbf16>, vector<1x8x8xbf16>, vector<1x8x8xbf16> -> vector<4x8x8xbf16>
    %c0_9 = arith.constant 0 : index
    %c0_10 = arith.constant 0 : index
    %c0_11 = arith.constant 0 : index
    %28 = vector.load %arg19[%c0_9, %c0_10, %c0_11] : memref<4x8x8xbf16, #tpu.memory_space<vmem>>, vector<4x8x8xbf16>
    "tpu.trace_start"() <{level = 10 : i32, message = "nqd,nkd->nqk"}> : () -> ()
    %cst_12 = arith.constant dense<0.000000e+00> : vector<4x8x8xf32>
    %29 = tpu.matmul %27, %28, %cst_12 {dimension_numbers = #tpu.dot_dimension_numbers<[2], [2], [1], [1], [0, 0, 0, 1, 1, 1], [0], [0]>} : vector<4x8x8xbf16>, vector<4x8x8xbf16>, vector<4x8x8xf32> -> vector<4x8x8xf32>
    "tpu.trace_stop"() : () -> ()
    %30 = vector.shape_cast %9 : vector<1x8xf32> to vector<1x1x8xf32>
    %31 = vector.broadcast %30 : vector<1x1x8xf32> to vector<4x8x8xf32>
    %32 = arith.addf %29, %31 : vector<4x8x8xf32>
    %cst_13 = arith.constant dense<0xFF800000> : vector<4x8xf32>
    %33 = vector.multi_reduction <maximumf>, %32, %cst_13 [2] : vector<4x8x8xf32> to vector<4x8xf32>
    %34 = vector.shape_cast %33 : vector<4x8xf32> to vector<4x8x1xf32>
    %35 = vector.broadcast %34 : vector<4x8x1xf32> to vector<4x8x8xf32>
    %36 = arith.subf %32, %35 : vector<4x8x8xf32>
    %37 = math.exp %36 : vector<4x8x8xf32>
    %cst_14 = arith.constant dense<0.000000e+00> : vector<4x8xf32>
    %38 = vector.multi_reduction <add>, %37, %cst_14 [2] : vector<4x8x8xf32> to vector<4x8xf32>
    %39 = vector.shape_cast %38 : vector<4x8xf32> to vector<4x8x1xf32>
    %40 = tpu.reciprocal %39 {approx = true} : vector<4x8x1xf32> -> vector<4x8x1xf32>
    %41 = vector.broadcast %40 : vector<4x8x1xf32> to vector<4x8x8xf32>
    %42 = arith.mulf %37, %41 : vector<4x8x8xf32>
    %43 = arith.truncf %42 : vector<4x8x8xf32> to vector<4x8x8xbf16>
    %c0_15 = arith.constant 0 : index
    %c0_16 = arith.constant 0 : index
    %c0_17 = arith.constant 0 : index
    %44 = vector.load %arg20[%c0_15, %c0_16, %c0_17] : memref<4x8x8xbf16, #tpu.memory_space<vmem>>, vector<4x8x8xbf16>
    "tpu.trace_start"() <{level = 10 : i32, message = "nqk,nkd->nqd"}> : () -> ()
    %cst_18 = arith.constant dense<0.000000e+00> : vector<4x8x8xf32>
    %45 = tpu.matmul %43, %44, %cst_18 {dimension_numbers = #tpu.dot_dimension_numbers<[2], [1], [1], [2], [0, 0, 0, 1, 1, 2], [0], [0]>} : vector<4x8x8xbf16>, vector<4x8x8xbf16>, vector<4x8x8xf32> -> vector<4x8x8xf32>
    "tpu.trace_stop"() : () -> ()
    %46 = arith.truncf %45 : vector<4x8x8xf32> to vector<4x8x8xbf16>
    %47 = vector.extract_strided_slice %46 {offsets = [0, 0, 0], sizes = [1, 8, 8], strides = [1, 1, 1]} : vector<4x8x8xbf16> to vector<1x8x8xbf16>
    %48 = vector.shape_cast %47 : vector<1x8x8xbf16> to vector<8x8xbf16>
    %49 = vector.extract_strided_slice %46 {offsets = [1, 0, 0], sizes = [1, 8, 8], strides = [1, 1, 1]} : vector<4x8x8xbf16> to vector<1x8x8xbf16>
    %50 = vector.shape_cast %49 : vector<1x8x8xbf16> to vector<8x8xbf16>
    %51 = vector.extract_strided_slice %46 {offsets = [2, 0, 0], sizes = [1, 8, 8], strides = [1, 1, 1]} : vector<4x8x8xbf16> to vector<1x8x8xbf16>
    %52 = vector.shape_cast %51 : vector<1x8x8xbf16> to vector<8x8xbf16>
    %53 = vector.extract_strided_slice %46 {offsets = [3, 0, 0], sizes = [1, 8, 8], strides = [1, 1, 1]} : vector<4x8x8xbf16> to vector<1x8x8xbf16>
    %54 = vector.shape_cast %53 : vector<1x8x8xbf16> to vector<8x8xbf16>
    %55 = tpu.concatenate %48, %50, %52, %54 in 1 : vector<8x8xbf16>, vector<8x8xbf16>, vector<8x8xbf16>, vector<8x8xbf16> -> vector<8x32xbf16>
    %c0_19 = arith.constant 0 : index
    %c0_20 = arith.constant 0 : index
    %56 = vector.load %arg8[%c0_19, %c0_20] : memref<32x32xbf16, #tpu.memory_space<vmem>>, vector<32x32xbf16>
    %cst_21 = arith.constant dense<0.000000e+00> : vector<8x32xf32>
    %57 = tpu.matmul %55, %56, %cst_21 {dimension_numbers = #tpu.dot_dimension_numbers<[1], [0], [0], [1], [0, 0, 1, 1], [], []>} : vector<8x32xbf16>, vector<32x32xbf16>, vector<8x32xf32> -> vector<8x32xf32>
    %c0_22 = arith.constant 0 : index
    %c0_23 = arith.constant 0 : index
    %58 = vector.load %arg9[%c0_22, %c0_23] : memref<1x32xf32, #tpu.memory_space<vmem>>, vector<1x32xf32>
    %59 = vector.shape_cast %58 : vector<1x32xf32> to vector<32xf32>
    %60 = vector.shape_cast %59 : vector<32xf32> to vector<1x32xf32>
    %61 = vector.broadcast %60 : vector<1x32xf32> to vector<8x32xf32>
    %62 = arith.addf %57, %61 : vector<8x32xf32>
    %63 = arith.addf %62, %7 : vector<8x32xf32>
    %c0_24 = arith.constant 0 : index
    %c0_25 = arith.constant 0 : index
    %64 = vector.load %arg10[%c0_24, %c0_25] : memref<1x32xf32, #tpu.memory_space<vmem>>, vector<1x32xf32>
    %65 = vector.shape_cast %64 : vector<1x32xf32> to vector<32xf32>
    %c0_26 = arith.constant 0 : index
    %c0_27 = arith.constant 0 : index
    %66 = vector.load %arg11[%c0_26, %c0_27] : memref<1x32xf32, #tpu.memory_space<vmem>>, vector<1x32xf32>
    %67 = vector.shape_cast %66 : vector<1x32xf32> to vector<32xf32>
    %cst_28 = arith.constant dense<0.000000e+00> : vector<8xf32>
    %68 = vector.multi_reduction <add>, %63, %cst_28 [1] : vector<8x32xf32> to vector<8xf32>
    %69 = vector.shape_cast %68 : vector<8xf32> to vector<8x1xf32>
    %cst_29 = arith.constant 3.200000e+01 : f32
    %70 = vector.broadcast %cst_29 : f32 to vector<8x1xf32>
    %71 = arith.divf %69, %70 : vector<8x1xf32>
    %72 = vector.broadcast %71 : vector<8x1xf32> to vector<8x32xf32>
    %73 = arith.subf %63, %72 : vector<8x32xf32>
    %74 = arith.mulf %73, %73 : vector<8x32xf32>
    %cst_30 = arith.constant dense<0.000000e+00> : vector<8xf32>
    %75 = vector.multi_reduction <add>, %74, %cst_30 [1] : vector<8x32xf32> to vector<8xf32>
    %76 = vector.shape_cast %75 : vector<8xf32> to vector<8x1xf32>
    %cst_31 = arith.constant 3.200000e+01 : f32
    %77 = vector.broadcast %cst_31 : f32 to vector<8x1xf32>
    %78 = arith.divf %76, %77 : vector<8x1xf32>
    %79 = vector.broadcast %71 : vector<8x1xf32> to vector<8x32xf32>
    %80 = arith.subf %63, %79 : vector<8x32xf32>
    %cst_32 = arith.constant 9.99999996E-13 : f32
    %81 = vector.broadcast %cst_32 : f32 to vector<8x1xf32>
    %82 = arith.addf %78, %81 : vector<8x1xf32>
    %83 = math.rsqrt %82 : vector<8x1xf32>
    %84 = vector.broadcast %83 : vector<8x1xf32> to vector<8x32xf32>
    %85 = arith.mulf %80, %84 : vector<8x32xf32>
    %86 = vector.shape_cast %65 : vector<32xf32> to vector<1x32xf32>
    %87 = vector.broadcast %86 : vector<1x32xf32> to vector<8x32xf32>
    %88 = arith.mulf %85, %87 : vector<8x32xf32>
    %89 = vector.shape_cast %67 : vector<32xf32> to vector<1x32xf32>
    %90 = vector.broadcast %89 : vector<1x32xf32> to vector<8x32xf32>
    %91 = arith.addf %88, %90 : vector<8x32xf32>
    %92 = arith.truncf %91 : vector<8x32xf32> to vector<8x32xbf16>
    %c0_33 = arith.constant 0 : index
    %c0_34 = arith.constant 0 : index
    %93 = vector.load %arg12[%c0_33, %c0_34] : memref<32x64xbf16, #tpu.memory_space<vmem>>, vector<32x64xbf16>
    %cst_35 = arith.constant dense<0.000000e+00> : vector<8x64xf32>
    %94 = tpu.matmul %92, %93, %cst_35 {dimension_numbers = #tpu.dot_dimension_numbers<[1], [0], [0], [1], [0, 0, 1, 1], [], []>} : vector<8x32xbf16>, vector<32x64xbf16>, vector<8x64xf32> -> vector<8x64xf32>
    %c0_36 = arith.constant 0 : index
    %c0_37 = arith.constant 0 : index
    %95 = vector.load %arg13[%c0_36, %c0_37] : memref<1x64xf32, #tpu.memory_space<vmem>>, vector<1x64xf32>
    %96 = vector.shape_cast %95 : vector<1x64xf32> to vector<64xf32>
    %97 = vector.shape_cast %96 : vector<64xf32> to vector<1x64xf32>
    %98 = vector.broadcast %97 : vector<1x64xf32> to vector<8x64xf32>
    %99 = arith.addf %94, %98 : vector<8x64xf32>
    %cst_38 = arith.constant 5.000000e-01 : f32
    %100 = vector.broadcast %cst_38 : f32 to vector<8x64xf32>
    %101 = arith.mulf %100, %99 : vector<8x64xf32>
    %cst_39 = arith.constant 0.707106769 : f32
    %102 = vector.broadcast %cst_39 : f32 to vector<8x64xf32>
    %103 = arith.mulf %99, %102 : vector<8x64xf32>
    %104 = math.erf %103 : vector<8x64xf32>
    %cst_40 = arith.constant 1.000000e+00 : f32
    %105 = vector.broadcast %cst_40 : f32 to vector<8x64xf32>
    %106 = arith.addf %105, %104 : vector<8x64xf32>
    %107 = arith.mulf %101, %106 : vector<8x64xf32>
    %108 = arith.truncf %107 : vector<8x64xf32> to vector<8x64xbf16>
    %c0_41 = arith.constant 0 : index
    %c0_42 = arith.constant 0 : index
    %109 = vector.load %arg14[%c0_41, %c0_42] : memref<64x32xbf16, #tpu.memory_space<vmem>>, vector<64x32xbf16>
    %cst_43 = arith.constant dense<0.000000e+00> : vector<8x32xf32>
    %110 = tpu.matmul %108, %109, %cst_43 {dimension_numbers = #tpu.dot_dimension_numbers<[1], [0], [0], [1], [0, 0, 1, 1], [], []>} : vector<8x64xbf16>, vector<64x32xbf16>, vector<8x32xf32> -> vector<8x32xf32>
    %c0_44 = arith.constant 0 : index
    %c0_45 = arith.constant 0 : index
    %111 = vector.load %arg15[%c0_44, %c0_45] : memref<1x32xf32, #tpu.memory_space<vmem>>, vector<1x32xf32>
    %112 = vector.shape_cast %111 : vector<1x32xf32> to vector<32xf32>
    %113 = vector.shape_cast %112 : vector<32xf32> to vector<1x32xf32>
    %114 = vector.broadcast %113 : vector<1x32xf32> to vector<8x32xf32>
    %115 = arith.addf %110, %114 : vector<8x32xf32>
    %116 = arith.addf %115, %91 : vector<8x32xf32>
    %c0_46 = arith.constant 0 : index
    %c0_47 = arith.constant 0 : index
    %117 = vector.load %arg16[%c0_46, %c0_47] : memref<1x32xf32, #tpu.memory_space<vmem>>, vector<1x32xf32>
    %118 = vector.shape_cast %117 : vector<1x32xf32> to vector<32xf32>
    %c0_48 = arith.constant 0 : index
    %c0_49 = arith.constant 0 : index
    %119 = vector.load %arg17[%c0_48, %c0_49] : memref<1x32xf32, #tpu.memory_space<vmem>>, vector<1x32xf32>
    %120 = vector.shape_cast %119 : vector<1x32xf32> to vector<32xf32>
    %cst_50 = arith.constant dense<0.000000e+00> : vector<8xf32>
    %121 = vector.multi_reduction <add>, %116, %cst_50 [1] : vector<8x32xf32> to vector<8xf32>
    %122 = vector.shape_cast %121 : vector<8xf32> to vector<8x1xf32>
    %cst_51 = arith.constant 3.200000e+01 : f32
    %123 = vector.broadcast %cst_51 : f32 to vector<8x1xf32>
    %124 = arith.divf %122, %123 : vector<8x1xf32>
    %125 = vector.broadcast %124 : vector<8x1xf32> to vector<8x32xf32>
    %126 = arith.subf %116, %125 : vector<8x32xf32>
    %127 = arith.mulf %126, %126 : vector<8x32xf32>
    %cst_52 = arith.constant dense<0.000000e+00> : vector<8xf32>
    %128 = vector.multi_reduction <add>, %127, %cst_52 [1] : vector<8x32xf32> to vector<8xf32>
    %129 = vector.shape_cast %128 : vector<8xf32> to vector<8x1xf32>
    %cst_53 = arith.constant 3.200000e+01 : f32
    %130 = vector.broadcast %cst_53 : f32 to vector<8x1xf32>
    %131 = arith.divf %129, %130 : vector<8x1xf32>
    %132 = vector.broadcast %124 : vector<8x1xf32> to vector<8x32xf32>
    %133 = arith.subf %116, %132 : vector<8x32xf32>
    %cst_54 = arith.constant 9.99999996E-13 : f32
    %134 = vector.broadcast %cst_54 : f32 to vector<8x1xf32>
    %135 = arith.addf %131, %134 : vector<8x1xf32>
    %136 = math.rsqrt %135 : vector<8x1xf32>
    %137 = vector.broadcast %136 : vector<8x1xf32> to vector<8x32xf32>
    %138 = arith.mulf %133, %137 : vector<8x32xf32>
    %139 = vector.shape_cast %118 : vector<32xf32> to vector<1x32xf32>
    %140 = vector.broadcast %139 : vector<1x32xf32> to vector<8x32xf32>
    %141 = arith.mulf %138, %140 : vector<8x32xf32>
    %142 = vector.shape_cast %120 : vector<32xf32> to vector<1x32xf32>
    %143 = vector.broadcast %142 : vector<1x32xf32> to vector<8x32xf32>
    %144 = arith.addf %141, %143 : vector<8x32xf32>
    %145 = arith.truncf %144 : vector<8x32xf32> to vector<8x32xbf16>
    %c0_55 = arith.constant 0 : index
    %c0_56 = arith.constant 0 : index
    %c0_57 = arith.constant 0 : index
    %146 = vector.load %arg18[%c0_55, %c0_56, %c0_57] : memref<1x8x32xbf16, #tpu.memory_space<vmem>>, vector<1x8x32xbf16>
    %147 = vector.shape_cast %146 : vector<1x8x32xbf16> to vector<8x32xbf16>
    %148 = vector.shape_cast %145 : vector<8x32xbf16> to vector<1x8x32xbf16>
    tpu.vector_store %arg18[%c0_55, %c0_56, %c0_57], %148 {strides = array<i32>} : memref<1x8x32xbf16, #tpu.memory_space<vmem>>, vector<1x8x32xbf16>,
    return
  }
  func.func @transform_0(%arg0: i32, %arg1: i32) -> (i32, i32, i32) {
    %c0_i32 = arith.constant 0 : i32
    %c0_i32_0 = arith.constant 0 : i32
    %c0_i32_1 = arith.constant 0 : i32
    return %arg0, %c0_i32, %c0_i32_0 : i32, i32, i32
  }
  func.func @transform_1(%arg0: i32, %arg1: i32) -> (i32, i32, i32) {
    %c0_i32 = arith.constant 0 : i32
    %c0_i32_0 = arith.constant 0 : i32
    %c0_i32_1 = arith.constant 0 : i32
    return %arg0, %c0_i32, %c0_i32_0 : i32, i32, i32
  }
  func.func @transform_2(%arg0: i32, %arg1: i32) -> (i32, i32) {
    %c0_i32 = arith.constant 0 : i32
    %c0_i32_0 = arith.constant 0 : i32
    %c0_i32_1 = arith.constant 0 : i32
    return %c0_i32, %c0_i32_0 : i32, i32
  }
  func.func @transform_3(%arg0: i32, %arg1: i32) -> (i32, i32) {
    %c0_i32 = arith.constant 0 : i32
    %c0_i32_0 = arith.constant 0 : i32
    %c0_i32_1 = arith.constant 0 : i32
    return %c0_i32, %c0_i32_0 : i32, i32
  }
  func.func @transform_4(%arg0: i32, %arg1: i32) -> (i32, i32) {
    %c0_i32 = arith.constant 0 : i32
    %c0_i32_0 = arith.constant 0 : i32
    %c0_i32_1 = arith.constant 0 : i32
    return %c0_i32, %c0_i32_0 : i32, i32
  }
  func.func @transform_5(%arg0: i32, %arg1: i32) -> (i32, i32) {
    %c0_i32 = arith.constant 0 : i32
    %c0_i32_0 = arith.constant 0 : i32
    %c0_i32_1 = arith.constant 0 : i32
    return %c0_i32, %c0_i32_0 : i32, i32
  }
  func.func @transform_6(%arg0: i32, %arg1: i32) -> (i32, i32) {
    %c0_i32 = arith.constant 0 : i32
    %c0_i32_0 = arith.constant 0 : i32
    %c0_i32_1 = arith.constant 0 : i32
    return %c0_i32, %c0_i32_0 : i32, i32
  }
  func.func @transform_7(%arg0: i32, %arg1: i32) -> (i32, i32) {
    %c0_i32 = arith.constant 0 : i32
    %c0_i32_0 = arith.constant 0 : i32
    %c0_i32_1 = arith.constant 0 : i32
    return %c0_i32, %c0_i32_0 : i32, i32
  }
  func.func @transform_8(%arg0: i32, %arg1: i32) -> (i32, i32) {
    %c0_i32 = arith.constant 0 : i32
    %c0_i32_0 = arith.constant 0 : i32
    %c0_i32_1 = arith.constant 0 : i32
    return %c0_i32, %c0_i32_0 : i32, i32
  }
  func.func @transform_9(%arg0: i32, %arg1: i32) -> (i32, i32) {
    %c0_i32 = arith.constant 0 : i32
    %c0_i32_0 = arith.constant 0 : i32
    %c0_i32_1 = arith.constant 0 : i32
    return %c0_i32, %c0_i32_0 : i32, i32
  }
  func.func @transform_10(%arg0: i32, %arg1: i32) -> (i32, i32) {
    %c0_i32 = arith.constant 0 : i32
    %c0_i32_0 = arith.constant 0 : i32
    %c0_i32_1 = arith.constant 0 : i32
    return %c0_i32, %c0_i32_0 : i32, i32
  }
  func.func @transform_11(%arg0: i32, %arg1: i32) -> (i32, i32) {
    %c0_i32 = arith.constant 0 : i32
    %c0_i32_0 = arith.constant 0 : i32
    %c0_i32_1 = arith.constant 0 : i32
    return %c0_i32, %c0_i32_0 : i32, i32
  }
  func.func @transform_12(%arg0: i32, %arg1: i32) -> (i32, i32) {
    %c0_i32 = arith.constant 0 : i32
    %c0_i32_0 = arith.constant 0 : i32
    %c0_i32_1 = arith.constant 0 : i32
    return %c0_i32, %c0_i32_0 : i32, i32
  }
  func.func @transform_13(%arg0: i32, %arg1: i32) -> (i32, i32) {
    %c0_i32 = arith.constant 0 : i32
    %c0_i32_0 = arith.constant 0 : i32
    %c0_i32_1 = arith.constant 0 : i32
    return %c0_i32, %c0_i32_0 : i32, i32
  }
  func.func @transform_14(%arg0: i32, %arg1: i32) -> (i32, i32) {
    %c0_i32 = arith.constant 0 : i32
    %c0_i32_0 = arith.constant 0 : i32
    %c0_i32_1 = arith.constant 0 : i32
    return %c0_i32, %c0_i32_0 : i32, i32
  }
  func.func @transform_15(%arg0: i32, %arg1: i32) -> (i32, i32) {
    %c0_i32 = arith.constant 0 : i32
    %c0_i32_0 = arith.constant 0 : i32
    %c0_i32_1 = arith.constant 0 : i32
    return %c0_i32, %c0_i32_0 : i32, i32
  }
  func.func @transform_16(%arg0: i32, %arg1: i32) -> (i32, i32, i32) {
    %c0_i32 = arith.constant 0 : i32
    %c0_i32_0 = arith.constant 0 : i32
    return %arg0, %arg1, %c0_i32 : i32, i32, i32
  }
}

</mosaic_0001>

<bundles_post_ra>
// kernel: tpu_custom_call.1
= control target key start
LH: loop header
LB: loop body
LE: loop exit
PB: predicated region body
PF: predicated region fallthrough
CT: control target
= control target key end

     0   :  { %s2852_s0 = inlined_call_operand.vmem [shape: f32[2,8,32], index: 0, kind: input, shape index: {}]   ;;  %s2853_s1 = inlined_call_operand.hbm [shape: f32[2,1,8], index: 1, kind: input, shape index: {}]   ;;  %s2854_s2 = inlined_call_operand.vmem [shape: bf16[32,32], index: 2, kind: input, shape index: {}]   ;;  %s2855_s3 = inlined_call_operand.hbm [shape: f32[1,32], index: 3, kind: input, shape index: {}]   ;;  %s2856_s4 = inlined_call_operand.vmem [shape: bf16[32,64], index: 4, kind: input, shape index: {}]   ;;  %s2857_s5 = inlined_call_operand.hbm [shape: f32[1,64], index: 5, kind: input, shape index: {}]   ;;  %s2858_s6 = inlined_call_operand.hbm [shape: bf16[32,32], index: 6, kind: input, shape index: {}]   ;;  %s2859_s7 = inlined_call_operand.hbm [shape: f32[1,32], index: 7, kind: input, shape index: {}]   ;;  %s2860_s8 = inlined_call_operand.hbm [shape: f32[1,32], index: 8, kind: input, shape index: {}]   ;;  %s2861_s9 = inlined_call_operand.hbm [shape: f32[1,32], index: 9, kind: input, shape index: {}]   ;;  %s2862_s10 = inlined_call_operand.vmem [shape: bf16[32,64], index: 10, kind: input, shape index: {}]   ;;  %s2863_s11 = inlined_call_operand.vmem [shape: f32[1,64], index: 11, kind: input, shape index: {}]   ;;  %s2864_s12 = inlined_call_operand.vmem [shape: bf16[64,32], index: 12, kind: input, shape index: {}]   ;;  %s2865_s13 = inlined_call_operand.vmem [shape: f32[1,32], index: 13, kind: input, shape index: {}]   ;;  %s2866_s14 = inlined_call_operand.vmem [shape: f32[1,32], index: 14, kind: input, shape index: {}]   ;;  %s2867_s15 = inlined_call_operand.vmem [shape: f32[1,32], index: 15, kind: input, shape index: {}]   ;;  %s2868_s16 = inlined_call_operand.hbm [shape: bf16[2,8,32], index: 16, kind: output, shape index: {}]  }
   0x1   :  { %2873 = sst [smem:[#allocation23_spill]] %s2852_s0 }
   0x2   :  { %2874 = sst [smem:[#allocation24_spill]] %s2855_s3 }
   0x3   :  { %2875 = sst [smem:[#allocation25_spill]] %s2857_s5 }
   0x4   :  { %2876 = sst [smem:[#allocation26_spill]] %s2858_s6 }
   0x5   :  { %2877 = sst [smem:[#allocation27_spill]] %s2859_s7 }
   0x6   :  { %2878 = sst [smem:[#allocation28_spill]] %s2860_s8 }
   0x7   :  { %2879 = sst [smem:[#allocation29_spill]] %s2861_s9 }
   0x8   :  { %2880 = sst [smem:[#allocation30_spill]] %s2865_s13 }
   0x9   :  { %2881 = sst [smem:[#allocation31_spill]] %s2866_s14 }
   0xa   :  { %2882 = sst [smem:[#allocation32_spill]] %s2867_s15 }
   0xb   :  { %2883 = sst [smem:[#allocation33_spill]] %s2868_s16 }
   0xc   :  { %21 = vsyncpa [#allocation5], 0 }
   0xd   :  { %23 = vsyncpa [#allocation5 + $0x1], 0 }
   0xe   :  { %24 = vsyncpa [#allocation8], 0 }
   0xf   :  { %25 = vsyncpa [#allocation11], 0 }
  0x10   :  { %26 = vsyncpa [#allocation14], 0 }
  0x11   :  { %27 = vsyncpa [#allocation6], 0 }
  0x12   :  { %29 = vsyncpa [#allocation6 + $0x1], 0  ;;  %s2479_s21 = smov 0   ;;  %s2481_s22 = smov 0  }
  0x13   :  { %s2483_s23 = smov 0   ;;  %s2485_s24 = smov 0  }
  0x14   :  { %s2487_s25 = smov 0   ;;  %s2489_s26 = smov 0  }
  0x15 LB: > { %s2869_s27 = sadd.s32 4294967295, %s2370_s26   ;;  %p1739_p0 = scmp.ge.s32.totalorder %s2370_s26, 1  ;;  %s2370_s26 = sphi %s2489_s26, %s35_s26   ;;  %s2366_s25 = sphi %s2487_s25, %s2914_s25   ;;  %s2362_s24 = sphi %s2485_s24, %s2913_s24   ;;  %s2358_s23 = sphi %s2483_s23, %s2912_s23   ;;  %s2354_s22 = sphi %s2481_s22, %s2911_s22   ;;  %s2350_s21 = sphi %s2479_s21, %s2910_s21  }
  0x16   : > { %p2513_p1 = scmp.eq.s32.totalorder %s2869_s27, 0  ;;  %p426_p2 = scmp.lt.s32.totalorder %s2370_s26, 3 }
  0x17   : > { %s2372_s30 = smov [#allocation7]   ;;  %s2373_s17 = smov [#allocation10]  }
  0x18   : > { %p2518_p3 = pnand %p1739_p0, %p426_p2  ;;  %s442_s0 = sshll.u32 %s2372_s30, 4  ;;  %s443_s0 = int_to_ptr.vmem [resolvable:$true] %s442_s0 }
  0x19   : > { %s466_s18 = sshll.u32 %s2373_s17, 4  ;;  %s2374_s20 = smov [#allocation13]   ;;  %s2531_s18 = int_to_ptr.vmem [resolvable:$true] %s466_s18 }
  0x1a   : > { %s2885_s29 = scalar_select %p2518_p3, 1, 0 }
  0x1b   : > { %p1951_p5 = pneg %p2518_p3  ;;  %s491_s27 = sshll.u32 %s2374_s20, 4  ;;  %s492_s27 = int_to_ptr.vmem [resolvable:$true] %s491_s27 }
  0x1c   : > { %s2105_s30 = scalar_lea.vmem %s443_s0, 16  ;;  %s2112_s17 = scalar_lea.vmem %s443_s0, 32 }
  0x1d   : > { %p2527_p6 = pnand %p1951_p5, %p2513_p1  ;;  %p2106_p8 = scmp.ne.s32.totalorder %s443_s0, %s2105_s30 }
  0x1e   : > { %p2113_p11 = scmp.lt.s32.totalorder %s443_s0, %s443_s0  ;;  %p2114_p12 = scmp.lt.s32.totalorder %s2112_s17, %s2105_s30 }
  0x1f   : > { %p2535_p7 = pneg %p2527_p6 }
  0x20   : > { %p2115_p13 = por %p2114_p12, %p2113_p11 }
  0x21   : > { %p2108_p9 = pnand %p2106_p8, %p2535_p7 }
  0x23   : > { %p2109_p10 = pneg %p2108_p9 }
  0x25   : > { %p2116_p0 = pnand %p2115_p13, %p2109_p10 }
  0x27   : > { %2119 = shalt.err (!%p2116_p0)
}
  0x28   : > { %s2888_s3 = sld [smem:[#allocation24_spill]]  ;;  %s2131_s14 = scalar_lea.vmem %s2531_s18, 256 }
  0x29   : > { %p2132_p2 = scmp.ne.s32.totalorder %s2531_s18, %s2131_s14  ;;  %p2139_p9 = scmp.lt.s32.totalorder %s2531_s18, %s2531_s18 }
  0x2a   : > { %p2140_p11 = scmp.lt.s32.totalorder %s2131_s14, %s2131_s14 }
  0x2b   : > { %p2134_p5 = pnand %p2132_p2, %p2535_p7 }
  0x2c   : > { %p2141_p10 = por %p2140_p11, %p2139_p9 }
  0x2d   : > { %p2135_p8 = pneg %p2134_p5 }
  0x2e   : > { %1954 = dma.hbm_to_vmem [thread:$0]  (!%p2527_p6), %s2888_s3, 16, %s443_s0, [#allocation8]  }
  0x2f   : > { %p2142_p12 = pnand %p2141_p10, %p2135_p8 }
  0x31   : > { %2145 = shalt.err (!%p2142_p12)
}
  0x32   : > { %s2375_s30 = smov 64   ;;  %s2376_s15 = smov 4  }
  0x33   : > { %s2889_s6 = sld [smem:[#allocation26_spill]]  ;;  %s2157_s0 = scalar_lea.vmem %s492_s27, 16 }
  0x34   : > { %p2158_p13 = scmp.ne.s32.totalorder %s492_s27, %s2157_s0  ;;  %s2164_s14 = scalar_lea.vmem %s492_s27, 32 }
  0x35   : > { %p2165_p5 = scmp.lt.s32.totalorder %s492_s27, %s492_s27  ;;  %p2166_p8 = scmp.lt.s32.totalorder %s2164_s14, %s2157_s0 }
  0x36   : > { %p2160_p0 = pnand %p2158_p13, %p2535_p7 }
  0x37   : > { %p2167_p9 = por %p2166_p8, %p2165_p5 }
  0x38   : > { %p2161_p2 = pneg %p2160_p0 }
  0x39   : > { %1960 = dma.hbm_to_vmem [thread:$0]  (!%p2527_p6), %s2889_s6, 256, %s2531_s18, [#allocation11], %s2375_s30, %s2375_s30, %s2376_s15  }
  0x3a   : > { %p2168_p11 = pnand %p2167_p9, %p2161_p2 }
  0x3c   : > { %2171 = shalt.err (!%p2168_p11)
}
  0x3d   : > { %s2890_s8 = sld [smem:[#allocation28_spill]]  ;;  %s2377_s18 = smov [#allocation9]  }
  0x3e   : > { %s456_s30 = sshll.u32 %s2377_s18, 4  ;;  %s2378_s15 = smov [#allocation12]   ;;  %s457_s30 = int_to_ptr.vmem [resolvable:$true] %s456_s30 }
  0x3f   : > { %s480_s17 = sshll.u32 %s2378_s15, 4  ;;  %s2183_s20 = scalar_lea.vmem %s457_s30, 16  ;;  %s481_s17 = int_to_ptr.vmem [resolvable:$true] %s480_s17 }
  0x40   : > { %p2184_p10 = scmp.ne.s32.totalorder %s457_s30, %s2183_s20  ;;  %s2190_s0 = scalar_lea.vmem %s457_s30, 32 }
  0x41   : > { %p2191_p0 = scmp.lt.s32.totalorder %s457_s30, %s457_s30  ;;  %p2192_p2 = scmp.lt.s32.totalorder %s2190_s0, %s2183_s20 }
  0x42   : > { %p2186_p12 = pnand %p2184_p10, %p2535_p7 }
  0x43   : > { %1966 = dma.hbm_to_vmem [thread:$0]  (!%p2527_p6), %s2890_s8, 16, %s492_s27, [#allocation14]  }
  0x44   : > { %p2187_p13 = pneg %p2186_p12  ;;  %p2193_p5 = por %p2192_p2, %p2191_p0 }
  0x46   : > { %p2194_p8 = pnand %p2193_p5, %p2187_p13 }
  0x48   : > { %2197 = shalt.err (!%p2194_p8)
}
  0x49   : > { %s2891_s5 = sld [smem:[#allocation25_spill]]  ;;  %s2209_s27 = scalar_lea.vmem %s481_s17, 16 }
  0x4a   : > { %p2210_p9 = scmp.ne.s32.totalorder %s481_s17, %s2209_s27  ;;  %s2216_s14 = scalar_lea.vmem %s481_s17, 32 }
  0x4b   : > { %p2217_p12 = scmp.lt.s32.totalorder %s481_s17, %s481_s17  ;;  %p2218_p4 = scmp.lt.s32.totalorder %s2216_s14, %s2209_s27 }
  0x4c   : > { %p2212_p11 = pnand %p2210_p9, %p2535_p7 }
  0x4d   : > { %p2219_p3 = por %p2218_p4, %p2217_p12 }
  0x4e   : > { %p2213_p10 = pneg %p2212_p11 }
  0x4f   : > { %1957 = dma.hbm_to_vmem [thread:$0]  (!%p2527_p6), %s2891_s5, 16, %s457_s30, [#allocation8]  }
  0x50   : > { %p2220_p0 = pnand %p2219_p3, %p2213_p10 }
  0x52   : > { %2223 = shalt.err (!%p2220_p0)
}
  0x53   : > { %s2892_s7 = sld [smem:[#allocation27_spill]]  ;;  %s2379_s30 = smov [#allocation15]  }
  0x54   : > { %s502_s20 = sshll.u32 %s2379_s30, 4  ;;  %s503_s20 = int_to_ptr.vmem [resolvable:$true] %s502_s20 }
  0x55   : > { %s2235_s0 = scalar_lea.vmem %s503_s20, 16  ;;  %s2242_s3 = scalar_lea.vmem %s503_s20, 32 }
  0x56   : > { %p2236_p13 = scmp.ne.s32.totalorder %s503_s20, %s2235_s0  ;;  %p2243_p8 = scmp.lt.s32.totalorder %s503_s20, %s503_s20 }
  0x57   : > { %p2244_p4 = scmp.lt.s32.totalorder %s2242_s3, %s2235_s0 }
  0x58   : > { %p2238_p2 = pnand %p2236_p13, %p2535_p7 }
  0x59   : > { %1963 = dma.hbm_to_vmem [thread:$0]  (!%p2527_p6), %s2892_s7, 16, %s481_s17, [#allocation11]  }
  0x5a   : > { %p2239_p5 = pneg %p2238_p2  ;;  %p2245_p3 = por %p2244_p4, %p2243_p8 }
  0x5c   : > { %p2246_p9 = pnand %p2245_p3, %p2239_p5 }
  0x5e   : > { %2249 = shalt.err (!%p2246_p9)
}
  0x5f   : > { %s2893_s9 = sld [smem:[#allocation29_spill]]  ;;  %s1738_s16 = sadd.s32 4294967294, %s2370_s26  }
  0x60   : > { %s47_s17 = sadd.s32 1, %s2366_s25  ;;  %s80_s19 = sadd.s32 1, %s2358_s23 }
  0x61   : > { %p49_p7 = scmp.ge.s32.totalorder %s47_s17, 2  ;;  %p87_p11 = scmp.ne.s32.totalorder %s2358_s23, %s2354_s22 }
  0x62   : > { %p88_p10 = scmp.eq.s32.totalorder %s2370_s26, 0  ;;  %p93_p0 = scmp.ne.s32.totalorder %s2354_s22, %s2350_s21 }
  0x63   : > { %s2916_s17 = smov (%p49_p7, %s47_s17), 0  ;;  %s2896_s15 = sadd.s32 4294967295, %s2370_s26  }
  0x64   : > { %2894 = sst [smem:[#allocation22_spill]] %s2916_s17  ;;  %p2594_p12 = por %p88_p10, %p87_p11 }
  0x65   : > { %1969 = dma.hbm_to_vmem [thread:$0]  (!%p2527_p6), %s2893_s9, 16, %s503_s20, [#allocation14]  }
  0x66   : > { %s77_s18 = ssub.s32 %s2366_s25, %s2916_s17  ;;  %p413_p6 = scmp.eq.s32.totalorder %s2896_s15, 1 }
  0x67   : > { %p78_p13 = scmp.eq.s32.totalorder %s77_s18, 0  ;;  %p2606_p2 = por %p2513_p1, %p93_p0 }
  0x68   : > { %p2610_p5 = por %p413_p6, %p87_p11  ;;  %p419_p8 = scmp.eq.s32.totalorder %s1738_s16, 1 }
  0x69   : > { %s2615_s0 = scalar_select %p78_p13, %s2358_s23, %s80_s19  }
  0x6a   : > { %p2617_p4 = por %p419_p8, %p93_p0  ;;  %p1984_p3 = scmp.lt.s32.totalorder %s2370_s26, 2 }
  0x6b   : > { %s538_s13 = sand.u32 1, %s2358_s23   ;;  %s1747_s27 = sshll.u32 %s2366_s25, 4 }
  0x6c   : > { %s2899_s3 = scalar_select %p2617_p4, 1, 0 }
  0x6d   : > { %s546_s5 = scalar_lea.hbm %s2853_s1, %s1747_s27  ;;  %s541_s6 = scalar_lea.vmem [#allocation4], %s538_s13 }
  0x6e   : > { %s548_s7 = sshll.u32 %s541_s6, 4  ;;  %p2629_p9 = pnand %p1984_p3, %p2594_p12  ;;  %s549_s7 = int_to_ptr.vmem [resolvable:$true] %s548_s7 }
  0x6f   : > { %s539_s16 = scalar_lea.sflag [#allocation5], %s538_s13  ;;  %s2263_s19 = scalar_lea.vmem %s549_s7, 16 }
  0x70   : > { %p2252_p7 = pneg %p2629_p9  ;;  %p2264_p11 = scmp.ne.s32.totalorder %s549_s7, %s2263_s19 }
  0x71   : > { %s2380_s9 = smov [#allocation4]  }
  0x72   : > { %p2266_p10 = pnand %p2264_p11, %p2252_p7  ;;  %s2268_s17 = sshll.u32 %s2380_s9, 4  ;;  %s2269_s17 = int_to_ptr.vmem [resolvable:$false] %s2268_s17 }
  0x73   : > { %s2270_s27 = scalar_lea.vmem %s2269_s17, 32  ;;  %p2271_p6 = scmp.lt.s32.totalorder %s549_s7, %s2269_s17 }
  0x74   : > { %p2267_p0 = pneg %p2266_p10  ;;  %p2272_p13 = scmp.lt.s32.totalorder %s2270_s27, %s2263_s19 }
  0x76   : > { %p2273_p8 = por %p2272_p13, %p2271_p6 }
  0x78   : > { %p2274_p4 = pnand %p2273_p8, %p2267_p0 }
  0x7a   : > { %2277 = shalt.err (!%p2274_p4)
}
  0x7b   : > { %1973 = dma.hbm_to_vmem [thread:$0]  (!%p2629_p9), %s546_s5, 16, %s549_s7, %s539_s16  }
  0x7c   : > { %p2901_p12 = scmp.ne.s32.totalorder %s2885_s29, 0 }
  0x7d   : > { %s2640_s6 = sand.u32 (!%p2901_p12), 1, %s2354_s22  }
  0x7e   : > { %557 = sbr.rel (%p2901_p12) target bundleno = 2554 (0x9fa), region = 84  ;;  %s560_s9 = scalar_lea.sflag (!%p2901_p12), [#allocation5], %s2640_s6 }
  0x7f   : > { %s562_s14 = scalar_lea.vmem (!%p2901_p12), [#allocation4], %s2640_s6 }
  0x83   : > { %2329 = dma.done.wait (%p2606_p2), %s560_s9, 16  }
  0x84   : > { %2331 = vsyncadd (%p2606_p2), %s560_s9, 4294967280 }
  0x85   : > { %2333 = dma.done.wait (%p2513_p1), [#allocation8], 32  }
  0x86   : > { %2335 = vsyncadd (%p2513_p1), [#allocation8], 4294967264 }
  0x87   : > { %2337 = dma.done.wait (%p2513_p1), [#allocation11], 272  }
  0x88   : > { %2339 = vsyncadd (%p2513_p1), [#allocation11], 4294967024 }
  0x89   : > { %2341 = dma.done.wait (%p2513_p1), [#allocation14], 32  }
  0x8a   : > { %2343 = vsyncadd (%p2513_p1), [#allocation14], 4294967264  ;;  %p638_p2 = scmp.lt.s32.totalorder %s2362_s24, 1  ;;  %v2381_v0 = vmov 0.0   ;;  %vm2382_vm0 = vmmov 0   ;;  %s2902_s29 = sld [smem:[#allocation23_spill]] }
  0x8b   : > { %1831 = vmatprep.subr.bf16.mxu1 %v2381_v0  ;;  %1835 = vmatprep.mubr.msk.bf16.mxu1 %vm2382_vm0, %v2381_v0  ;;  %v2060_v1 = vld [vmem:[%s2856_s4 + $0x8] sm:$0xff]   ;;  %v2061_v2 = vld [vmem:[%s2856_s4] sm:$0xff]   ;;  %vm672_vm1 = vcmask 261120   ;;  %vm717_vm2 = vcmask 60416   ;;  %s2385_s8 = smov 112   ;;  %vm846_vm3 = vcmask 64512  }
  0x8c   : > { %s639_s5 = scalar_select %p638_p2, %s2362_s24, 1  ;;  %1847 = vmatprep.subr.bf16.mxu0 %v2381_v0  ;;  %1849 = vmatprep.mubr.msk.bf16.mxu0 %vm2382_vm0, %v2381_v0  ;;  %v2062_v4 = vld [vmem:[%s2854_s2 + $0x8] sm:$0xff]   ;;  %v2063_v6 = vld [vmem:[%s2854_s2] sm:$0xff]   ;;  %vm1086_vm4 = vcmask 1043456   ;;  %vm1284_vm5 = vcmask 130048   ;;  %vm1287_vm6 = vcmask 195584  }
  0x8d   : > { %1832 = vmatpush3.bf16.msra.mxu1 %v2060_v1  ;;  %v1757_v7 = vld [vmem:[#allocation9] ss:$0 sm:$0xff]  ;;  %v1762_v14 = vld [vmem:[#allocation7] ss:$0 sm:$0xff]  ;;  %v1766_v35 = vld [vmem:[%s562_s14] ss:$0 sm:$0xff] }
  0x8e   : > { %s1756_s7 = sshll.u32 %s639_s5, 3  ;;  %1833 = vmatprep.subr.bf16.mxu1 %v2381_v0  ;;  %s2383_s5 = smov 104   ;;  %vm1498_vm7 = vcmask 523264   ;;  %vm1573_vm8 = vcmask 257024  }
  0x8f   : > { %s2386_s14 = smov 96   ;;  %s2387_s28 = smov 80  }
  0x90   : > { %s641_s17 = scalar_lea.vmem %s2902_s29, %s1756_s7  ;;  %s2384_s7 = smov 120  }
  0x91   : > { %v2677_v3 = vld [vmem:[%s641_s17] sm:$0xff]  ;;  %1834 = vmatpush3.bf16.msra.mxu1 %v2061_v2  ;;  %s2388_s29 = smov 72   ;;  %s2389_s17 = smov 88  }
  0x92   : > { %v648_v5 = vpack.c.bf16 %v2677_v3, %v2677_v3  ;;  %1839 = vmatprep.subr.bf16.mxu1 %v2381_v0  ;;  %s2390_s30 = smov 16   ;;  %s2391_s13 = smov 8  }
  0x93   : > { %s2392_s18 = smov 24   ;;  %s2903_s16 = sld [smem:[#allocation30_spill]] }
  0x94   : > { %1836 = vmatmul.mubr.msk.bf16.vlgmr.msra.gmra.mxu1 %vm672_vm1, %v648_v5  ;;  %s1755_s19 = sshll.u32 %s2640_s6, 2  ;;  %s2393_s9 = smov [#allocation16]  }
  0x95   : > { %1840 = vmatpush3.bf16.msra.mxu1 %v2062_v4  ;;  %1843 = vmatprep.mubr.msk.bf16.mxu1 %vm2382_vm0, %v2381_v0 }
  0x96   : > { %1841 = vmatprep.subr.bf16.mxu1 %v2381_v0 }
  0x99   : > { %1842 = vmatpush3.bf16.msra.mxu1 %v2063_v6 }
  0x9a   : > { %1853 = vmatprep.subr.bf16.mxu1 %v2381_v0 }
  0x9c   : > { %1844 = vmatmul.mubr.msk.bf16.vlgmr.msra.gmra.mxu1 %vm672_vm1, %v648_v5 }
  0x9d   : > { %1855 = vmatprep.mubr.msk.bf16.mxu1 %vm2382_vm0, %v2381_v0 }
 0x154   : > { %v710_v8 = vpop.f32.mrf.mxu1 }
 0x155   : > { %v711_v9 = vadd.f32 %v1757_v7, %v710_v8 }
 0x156   : > { %v1837_v10 = vpop.f32.mrf.mxu1 }
 0x157   : > { %v2697_v11 = vpack.c.bf16 %v711_v9, %v711_v9 }
 0x158   : > { %v713_v12 = vpop.f32.mrf.mxu1 }
 0x159   : > { %718 = vst.msk [vmem:[#allocation2] sm:$0xf] %vm717_vm2, %v2697_v11  ;;  %746 = vrot.lane.b32.xlu1 %v2697_v11, %s2383_s5  ;;  %726 = vrot.lane.b32.xlu0 %v2697_v11, %s2384_s7 }
 0x15a   : > { %v1838_v13 = vpop.f32.mrf.mxu1 }
 0x15c   : > { %v822_v15 = vpop.f32.mrf.mxu1 }
 0x15d   : > { %736 = vrot.lane.b32.xlu0 %v2697_v11, %s2385_s8  ;;  %v823_v16 = vadd.f32 %v1762_v14, %v822_v15 }
 0x15e   : > { %v1845_v17 = vpop.f32.mrf.mxu1 }
 0x15f   : > { %v828_v18 = vpack.c.bf16 %v823_v16, %v823_v16 }
 0x160   : > { %v825_v19 = vpop.f32.mrf.mxu1  ;;  %v836_v20 = vld [vmem:[#allocation2] sm:$0xf] }
 0x161   : > { %v851_v21 = vsel %vm846_vm3, %v836_v20, 0  ;;  %830 = vrot.lane.b32.xlu1 %v828_v18, %s2384_s7  ;;  %832 = vrot.lane.b32.xlu0 %v828_v18, %s2385_s8 }
 0x162   : > { %1848 = vmatpush3.bf16.xpose.msra.mxu0 %v851_v21  ;;  %v1846_v22 = vpop.f32.mrf.mxu1 }
 0x163   : > { %1859 = vmatprep.subr.bf16.mxu0 %v2381_v0 }
 0x165   : > { %834 = vrot.lane.b32.xlu1 %v828_v18, %s2383_s5  ;;  %s2904_s5 = sld [smem:[#allocation31_spill]] }
 0x169   : > { %1850 = vmatmul.mubr.msk.bf16.vlgmr.msra.gmra.mxu0 %vm846_vm3, %v828_v18 }
 0x16a   : > { %1861 = vmatprep.mubr.msk.bf16.mxu0 %vm2382_vm0, %v2381_v0 }
 0x1cb   : > { %v747_v23 = vpop.permute.xlu1 %746  ;;  %v727_v24 = vpop.permute.xlu0 %726 }
 0x1cc   : > { %750 = vst.msk [vmem:[#allocation2 + $0xc] sm:$0xf] %vm717_vm2, %v747_v23  ;;  %730 = vst.msk [vmem:[#allocation2 + $0x4] sm:$0xf] %vm717_vm2, %v727_v24 }
 0x1cf   : > { %v737_v25 = vpop.permute.xlu0 %736 }
 0x1d0   : > { %740 = vst.msk [vmem:[#allocation2 + $0x8] sm:$0xf] %vm717_vm2, %v737_v25 }
 0x1d3   : > { %v837_v26 = vld [vmem:[#allocation2 + $0x4] sm:$0xf]  ;;  %v839_v30 = vld [vmem:[#allocation2 + $0xc] sm:$0xf]  ;;  %v831_v31 = vpop.permute.xlu1 %830  ;;  %v833_v33 = vpop.permute.xlu0 %832 }
 0x1d4   : > { %v897_v27 = vsel %vm846_vm3, %v837_v26, 0  ;;  %v989_v32 = vsel %vm846_vm3, %v839_v30, 0 }
 0x1d5   : > { %1854 = vmatpush3.bf16.xpose.msra.mxu1 %v897_v27 }
 0x1d6   : > { %1865 = vmatprep.subr.bf16.mxu1 %v2381_v0 }
 0x1d7   : > { %v838_v28 = vld [vmem:[#allocation2 + $0x8] sm:$0xf]  ;;  %v835_v34 = vpop.permute.xlu1 %834 }
 0x1d8   : > { %v943_v29 = vsel %vm846_vm3, %v838_v28, 0 }
 0x1d9   : > { %1860 = vmatpush3.bf16.xpose.msra.mxu0 %v943_v29 }
 0x1da   : > { %1871 = vmatprep.subr.bf16.mxu0 %v2381_v0 }
 0x1dc   : > { %1856 = vmatmul.mubr.msk.bf16.vlgmr.msra.gmra.mxu1 %vm846_vm3, %v831_v31 }
 0x1dd   : > { %1866 = vmatpush3.bf16.xpose.msra.mxu1 %v989_v32  ;;  %1867 = vmatprep.mubr.msk.bf16.mxu1 %vm2382_vm0, %v2381_v0 }
 0x1de   : > { %1877 = vmatprep.subr.bf16.mxu1 %v2381_v0 }
 0x1e0   : > { %1862 = vmatmul.mubr.msk.bf16.vlgmr.msra.gmra.mxu0 %vm846_vm3, %v833_v33 }
 0x1e1   : > { %1873 = vmatprep.mubr.msk.bf16.mxu0 %vm2382_vm0, %v2381_v0 }
 0x1e4   : > { %1868 = vmatmul.mubr.msk.bf16.vlgmr.msra.gmra.mxu1 %vm846_vm3, %v835_v34 }
 0x1e5   : > { %1879 = vmatprep.mubr.msk.bf16.mxu1 %vm2382_vm0, %v2381_v0 }
 0x229   : > { %v887_v36 = vpop.f32.mrf.mxu0 }
 0x22a   : > { %v888_v37 = vadd.f32 %v1766_v35, %v887_v36 }
 0x22b   : > { %v1851_v38 = vpop.f32.mrf.mxu0 }
 0x22c   : > { %v1031_v39 = vsel %vm846_vm3, %v888_v37, -inf }
 0x22d   : > { %1032 = vmax.xlane.f32.xlu0 %v1031_v39  ;;  %v890_v40 = vpop.f32.mrf.mxu0 }
 0x22f   : > { %v1852_v41 = vpop.f32.mrf.mxu0 }
 0x29c   : > { %v933_v42 = vpop.f32.mrf.mxu1 }
 0x29d   : > { %v934_v43 = vadd.f32 %v1766_v35, %v933_v42 }
 0x29e   : > { %v1857_v44 = vpop.f32.mrf.mxu1 }
 0x29f   : > { %v1034_v45 = vsel %vm846_vm3, %v934_v43, -inf }
 0x2a0   : > { %v979_v46 = vpop.f32.mrf.mxu0  ;;  %1035 = vmax.xlane.f32.xlu1 %v1034_v45  ;;  %v936_v47 = vpop.f32.mrf.mxu1 }
 0x2a1   : > { %v980_v48 = vadd.f32 %v1766_v35, %v979_v46 }
 0x2a2   : > { %v1858_v49 = vpop.f32.mrf.mxu1  ;;  %v1863_v50 = vpop.f32.mrf.mxu0 }
 0x2a3   : > { %v1037_v51 = vsel %vm846_vm3, %v980_v48, -inf  ;;  %v2064_v50 = vld [vmem:[#allocation10 + $0x8] sm:$0xff]  }
 0x2a4   : > { %1038 = vmax.xlane.f32.xlu0 %v1037_v51  ;;  %v982_v52 = vpop.f32.mrf.mxu0  ;;  %v1025_v53 = vpop.f32.mrf.mxu1  ;;  %v2065_v51 = vld [vmem:[#allocation10] sm:$0xff]  }
 0x2a5   : > { %v1026_v54 = vadd.f32 %v1766_v35, %v1025_v53 }
 0x2a6   : > { %v1864_v55 = vpop.f32.mrf.mxu0  ;;  %v1869_v56 = vpop.f32.mrf.mxu1 }
 0x2a7   : > { %v1040_v57 = vsel %vm846_vm3, %v1026_v54, -inf }
 0x2a8   : > { %1041 = vmax.xlane.f32.xlu0 %v1040_v57  ;;  %v1028_v58 = vpop.f32.mrf.mxu1 }
 0x2aa   : > { %v1870_v59 = vpop.f32.mrf.mxu1 }
 0x2b1   : > { %722 = vrot.lane.b32.xlu1 %v2697_v11, %s2386_s14  ;;  %s2905_s14 = sld [smem:[#allocation32_spill]] }
 0x2b6   : > { %v1033_v60 = vpop.xlane.xlu0 %1032 }
 0x2b7   : > { %v1043_v61 = vsub.f32 %v888_v37, %v1033_v60 }
 0x2b9   : > { %v1047_v62 = vmul.f32 1.442695, %v1043_v61 }
 0x2bb   : > { %2072 = vpow2.f32 %v1047_v62 }
 0x2c8   : > { %v2073_v63 = vpop.eup %2072 }
 0x2c9   : > { %v1055_v1 = vsel %vm846_vm3, %v2073_v63, 0.0 }
 0x2d5   : > { %1056 = vadd.xlane.f32.xlu1 %v1055_v1 }
 0x329   : > { %v1036_v2 = vpop.xlane.xlu1 %1035 }
 0x32a   : > { %v1044_v4 = vsub.f32 %v934_v43, %v1036_v2 }
 0x32c   : > { %v1049_v5 = vmul.f32 1.442695, %v1044_v4 }
 0x32d   : > { %v1039_v6 = vpop.xlane.xlu0 %1038  ;;  %v723_v7 = vpop.permute.xlu1 %722 }
 0x32e   : > { %2074 = vpow2.f32 %v1049_v5  ;;  %v1045_v8 = vsub.f32 %v980_v48, %v1039_v6  ;;  %725 = vst.msk [vmem:[#allocation3] sm:$0xf] %vm717_vm2, %v723_v7 }
 0x330   : > { %v1051_v9 = vmul.f32 1.442695, %v1045_v8 }
 0x331   : > { %v1042_v10 = vpop.xlane.xlu0 %1041 }
 0x332   : > { %2076 = vpow2.f32 %v1051_v9  ;;  %v1046_v12 = vsub.f32 %v1026_v54, %v1042_v10 }
 0x334   : > { %v1053_v13 = vmul.f32 1.442695, %v1046_v12 }
 0x335   : > { %v1079_v14 = vld [vmem:[#allocation3] sm:$0xf] }
 0x336   : > { %2078 = vpow2.f32 %v1053_v13  ;;  %v1088_v15 = vsel %vm1086_vm4, %v1079_v14, 0  ;;  %v1775_v13 = vld [vmem:[#allocation12] ss:$0 sm:$0xff] }
 0x337   : > { %1872 = vmatpush3.bf16.msra.mxu0 %v1088_v15 }
 0x338   : > { %1883 = vmatprep.subr.bf16.mxu0 %v2381_v0 }
 0x33b   : > { %v2075_v16 = vpop.eup %2074 }
 0x33c   : > { %v1058_v17 = vsel %vm846_vm3, %v2075_v16, 0.0 }
 0x33d   : > { %1059 = vadd.xlane.f32.xlu0 %v1058_v17 }
 0x33f   : > { %v2077_v18 = vpop.eup %2076 }
 0x340   : > { %v1061_v19 = vsel %vm846_vm3, %v2077_v18, 0.0 }
 0x341   : > { %1062 = vadd.xlane.f32.xlu1 %v1061_v19 }
 0x343   : > { %v2079_v20 = vpop.eup %2078 }
 0x344   : > { %v1064_v21 = vsel %vm846_vm3, %v2079_v20, 0.0 }
 0x345   : > { %1065 = vadd.xlane.f32.xlu0 %v1064_v21 }
 0x352   : > { %741 = vrot.lane.b32.xlu1 %v2697_v11, %s2387_s28  ;;  %s1794_s28 = sshll.u32 %s2362_s24, 6 }
 0x356   : > { %751 = vrot.lane.b32.xlu1 %v2697_v11, %s2388_s29  ;;  %s637_s29 = scalar_lea.vmem [#allocation16], %s1755_s19 }
 0x35b   : > { %731 = vrot.lane.b32.xlu0 %v2697_v11, %s2389_s17  ;;  %s1590_s17 = sshll.u32 %s637_s29, 4  ;;  %s1591_s17 = int_to_ptr.vmem [resolvable:$true] %s1590_s17 }
 0x35c   : > { %s2278_s27 = scalar_lea.vmem %s1591_s17, 64 }
 0x35d   : > { %p2279_p1 = scmp.ne.s32.totalorder %s1591_s17, %s2278_s27 }
 0x35e   : > { %v1057_v22 = vpop.xlane.xlu1 %1056 }
 0x35f   : > { %2080 = vrcp.f32 %v1057_v22  ;;  %p2280_p4 = pnand %p2279_p1, %p2610_p5 }
 0x361   : > { %p2281_p3 = pneg %p2280_p4 }
 0x36c   : > { %v2081_v23 = vpop.eup %2080 }
 0x36d   : > { %v1071_v24 = vmul.f32 %v2081_v23, %v2073_v63 }
 0x36f   : > { %v1075_v25 = vpack.c.bf16 %v1071_v24, %v1071_v24 }
 0x371   : > { %1874 = vmatmul.mubr.msk.bf16.vlgmr.msra.gmra.mxu0 %vm846_vm3, %v1075_v25 }
 0x372   : > { %1885 = vmatprep.mubr.msk.bf16.mxu0 %vm2382_vm0, %v2381_v0 }
 0x3c6   : > { %v1060_v26 = vpop.xlane.xlu0 %1059 }
 0x3c7   : > { %2082 = vrcp.f32 %v1060_v26  ;;  %v2066_v26 = vld [vmem:[%s2862_s10 + $0x8] sm:$0xff]  }
 0x3ca   : > { %v1063_v27 = vpop.xlane.xlu1 %1062 }
 0x3cb   : > { %2084 = vrcp.f32 %v1063_v27 }
 0x3ce   : > { %v742_v28 = vpop.permute.xlu1 %741  ;;  %v1066_v29 = vpop.xlane.xlu0 %1065 }
 0x3cf   : > { %745 = vst.msk [vmem:[#allocation3 + $0x8] sm:$0xf] %vm717_vm2, %v742_v28  ;;  %2086 = vrcp.f32 %v1066_v29 }
 0x3d2   : > { %v752_v11 = vpop.permute.xlu1 %751  ;;  %v732_v30 = vpop.permute.xlu0 %731 }
 0x3d3   : > { %755 = vst.msk [vmem:[#allocation3 + $0xc] sm:$0xf] %vm717_vm2, %v752_v11  ;;  %735 = vst.msk [vmem:[#allocation3 + $0x4] sm:$0xf] %vm717_vm2, %v732_v30  ;;  %v1779_v30 = vld [vmem:[#allocation13] ss:$0 sm:$0xff] }
 0x3d4   : > { %v2083_v31 = vpop.eup %2082 }
 0x3d5   : > { %v1072_v36 = vmul.f32 %v2083_v31, %v2075_v16 }
 0x3d6   : > { %v1081_v32 = vld [vmem:[#allocation3 + $0x8] sm:$0xf] }
 0x3d7   : > { %v1180_v33 = vsel %vm1086_vm4, %v1081_v32, 0  ;;  %v1076_v41 = vpack.c.bf16 %v1072_v36, %v1072_v36  ;;  %v1780_v32 = vld [vmem:[#allocation15] ss:$0 sm:$0xff] }
 0x3d8   : > { %v2085_v34 = vpop.eup %2084  ;;  %1884 = vmatpush3.bf16.msra.mxu0 %v1180_v33  ;;  %v2068_v36 = vld [vmem:[%s2864_s12 + $0x18] sm:$0xff]  }
 0x3d9   : > { %v1073_v35 = vmul.f32 %v2085_v34, %v2077_v18  ;;  %1895 = vmatprep.subr.bf16.mxu0 %v2381_v0 }
 0x3da   : > { %v1080_v37 = vld [vmem:[#allocation3 + $0x4] sm:$0xf]  ;;  %v1082_v40 = vld [vmem:[#allocation3 + $0xc] sm:$0xf] }
 0x3db   : > { %v1134_v38 = vsel %vm1086_vm4, %v1080_v37, 0  ;;  %v1077_v39 = vpack.c.bf16 %v1073_v35, %v1073_v35  ;;  %v1226_v43 = vsel %vm1086_vm4, %v1082_v40, 0  ;;  %v2069_v37 = vld [vmem:[%s2864_s12 + $0x10] sm:$0xff]   ;;  %v1781_v40 = vld [vmem:[%s2863_s11] ss:$0 sm:$0xff] }
 0x3dc   : > { %1878 = vmatpush3.bf16.msra.mxu1 %v1134_v38  ;;  %v2087_v42 = vpop.eup %2086  ;;  %v2070_v38 = vld [vmem:[%s2864_s12 + $0x8] sm:$0xff]  }
 0x3dd   : > { %1886 = vmatmul.mubr.msk.bf16.vlgmr.msra.gmra.mxu0 %vm846_vm3, %v1077_v39  ;;  %1889 = vmatprep.subr.bf16.mxu1 %v2381_v0  ;;  %v1074_v44 = vmul.f32 %v2087_v42, %v2079_v20  ;;  %v2071_v39 = vld [vmem:[%s2864_s12] sm:$0xff]  }
 0x3de   : > { %1899 = vmatprep.mubr.msk.bf16.mxu0 %vm2382_vm0, %v2381_v0  ;;  %1896 = vmatpush3.bf16.msra.mxu0 %v2064_v50 }
 0x3df   : > { %1880 = vmatmul.mubr.msk.bf16.vlgmr.msra.gmra.mxu1 %vm846_vm3, %v1076_v41  ;;  %v1078_v45 = vpack.c.bf16 %v1074_v44, %v1074_v44  ;;  %1897 = vmatprep.subr.bf16.mxu0 %v2381_v0 }
 0x3e0   : > { %1890 = vmatpush3.bf16.msra.mxu1 %v1226_v43  ;;  %1891 = vmatprep.mubr.msk.bf16.mxu1 %vm2382_vm0, %v2381_v0 }
 0x3e1   : > { %1903 = vmatprep.subr.bf16.mxu1 %v2381_v0 }
 0x3e2   : > { %1898 = vmatpush3.bf16.msra.mxu0 %v2065_v51  ;;  %v1785_v51 = vld [vmem:[%s2903_s16] ss:$0 sm:$0xff]  ;;  %s1576_s16 = scalar_lea.sflag [#allocation6], %s2640_s6 }
 0x3e3   : > { %1911 = vmatprep.subr.bf16.mxu0 %v2381_v0 }
 0x3e7   : > { %1892 = vmatmul.mubr.msk.bf16.vlgmr.msra.gmra.mxu1 %vm846_vm3, %v1078_v45 }
 0x3e8   : > { %1907 = vmatprep.mubr.msk.bf16.mxu1 %vm2382_vm0, %v2381_v0  ;;  %1904 = vmatpush3.bf16.msra.mxu1 %v2066_v26 }
 0x3e9   : > { %1905 = vmatprep.subr.bf16.mxu1 %v2381_v0 }
 0x431   : > { %v1124_v46 = vpop.f32.mrf.mxu0 }
 0x432   : > { %v1268_v6 = vpack.c.bf16 %v1124_v46, %v1124_v46 }
 0x433   : > { %v1875_v47 = vpop.f32.mrf.mxu0 }
 0x435   : > { %v1127_v48 = vpop.f32.mrf.mxu0 }
 0x437   : > { %v1876_v49 = vpop.f32.mrf.mxu0 }
 0x49d   : > { %v1216_v52 = vpop.f32.mrf.mxu0 }
 0x49e   : > { %v1270_v53 = vpack.c.bf16 %v1216_v52, %v1216_v52 }
 0x49f   : > { %v1170_v54 = vpop.f32.mrf.mxu1  ;;  %v1887_v55 = vpop.f32.mrf.mxu0 }
 0x4a0   : > { %v1269_v56 = vpack.c.bf16 %v1170_v54, %v1170_v54  ;;  %1276 = vrot.lane.b32.xlu1 %v1270_v53, %s2390_s30 }
 0x4a1   : > { %v1881_v57 = vpop.f32.mrf.mxu1  ;;  %v1219_v58 = vpop.f32.mrf.mxu0 }
 0x4a2   : > { %1273 = vrot.lane.b32.xlu0 %v1269_v56, %s2391_s13 }
 0x4a3   : > { %v1173_v59 = vpop.f32.mrf.mxu1  ;;  %v1888_v60 = vpop.f32.mrf.mxu0 }
 0x4a5   : > { %v1882_v61 = vpop.f32.mrf.mxu1 }
 0x4a7   : > { %v1262_v62 = vpop.f32.mrf.mxu1 }
 0x4a8   : > { %v1271_v63 = vpack.c.bf16 %v1262_v62, %v1262_v62 }
 0x4a9   : > { %v1893_v1 = vpop.f32.mrf.mxu1 }
 0x4aa   : > { %1279 = vrot.lane.b32.xlu0 %v1271_v63, %s2392_s18  ;;  %s2906_s18 = sld [smem:[#allocation33_spill]] }
 0x4ab   : > { %v1265_v2 = vpop.f32.mrf.mxu1 }
 0x4ad   : > { %v1894_v4 = vpop.f32.mrf.mxu1 }
 0x4b0   : > { %s1588_s15 = scalar_lea.hbm %s2906_s18, %s1794_s28 }
 0x512   : > { %v1277_v8 = vpop.permute.xlu1 %1276 }
 0x514   : > { %v1274_v5 = vpop.permute.xlu0 %1273 }
 0x515   : > { %v1283_v7 = vsel %vm846_vm3, %v1268_v6, %v1274_v5  ;;  %v1791_v6 = vld [vmem:[%s2904_s5] ss:$0 sm:$0xff]  ;;  %s2282_s5 = sshll.u32 %s2393_s9, 4  ;;  %s2283_s5 = int_to_ptr.vmem [resolvable:$false] %s2282_s5 }
 0x516   : > { %v1286_v9 = vsel %vm1284_vm5, %v1283_v7, %v1277_v8  ;;  %v1792_v8 = vld [vmem:[%s2905_s14] ss:$0 sm:$0xff]  ;;  %s2284_s24 = scalar_lea.vmem %s2283_s5, 128  ;;  %p2285_p9 = scmp.lt.s32.totalorder %s1591_s17, %s2283_s5 }
 0x517   : > { %p2286_p7 = scmp.lt.s32.totalorder %s2284_s24, %s2278_s27 }
 0x519   : > { %p2287_p11 = por %p2286_p7, %p2285_p9 }
 0x51b   : > { %p2288_p10 = pnand %p2287_p11, %p2281_p3 }
 0x51c   : > { %v1280_v10 = vpop.permute.xlu0 %1279 }
 0x51d   : > { %v1289_v12 = vsel %vm1287_vm6, %v1286_v9, %v1280_v10 }
 0x51e   : > { %1900 = vmatmul.mubr.msk.bf16.vlgmr.msra.gmra.mxu0 %vm672_vm1, %v1289_v12 }
 0x51f   : > { %1919 = vmatprep.mubr.msk.bf16.mxu0 %vm2382_vm0, %v2381_v0  ;;  %1912 = vmatpush3.bf16.msra.mxu0 %v2068_v36 }
 0x520   : > { %1913 = vmatprep.subr.bf16.mxu0 %v2381_v0 }
 0x523   : > { %1914 = vmatpush3.bf16.msra.mxu0 %v2069_v37 }
 0x524   : > { %1915 = vmatprep.subr.bf16.mxu0 %v2381_v0 }
 0x527   : > { %1916 = vmatpush3.bf16.msra.mxu0 %v2070_v38 }
 0x528   : > { %1917 = vmatprep.subr.bf16.mxu0 %v2381_v0 }
 0x52b   : > { %1918 = vmatpush3.bf16.msra.mxu0 %v2071_v39 }
 0x5de   : > { %v1349_v14 = vpop.f32.mrf.mxu0 }
 0x5df   : > { %v1350_v15 = vadd.f32 %v1775_v13, %v1349_v14 }
 0x5e0   : > { %v1901_v16 = vpop.f32.mrf.mxu0 }
 0x5e1   : > { %v1355_v17 = vadd.f32 %v1350_v15, %v2677_v3  ;;  %v2067_v3 = vld [vmem:[%s2862_s10] sm:$0xff]  }
 0x5e2   : > { %v1352_v18 = vpop.f32.mrf.mxu0  ;;  %1906 = vmatpush3.bf16.msra.mxu1 %v2067_v3 }
 0x5e3   : > { %v1358_v19 = vsel %vm672_vm1, %v1355_v17, 0.0 }
 0x5e4   : > { %1359 = vadd.xlane.f32.xlu1 %v1358_v19  ;;  %v1902_v20 = vpop.f32.mrf.mxu0 }
 0x66d   : > { %v1360_v21 = vpop.xlane.xlu1 %1359 }
 0x66e   : > { %v1362_v22 = vmul.f32 0.03125, %v1360_v21 }
 0x670   : > { %v1363_v23 = vsub.f32 %v1355_v17, %v1362_v22 }
 0x672   : > { %v1364_v24 = vmul.f32 %v1363_v23, %v1363_v23 }
 0x674   : > { %v1365_v25 = vsel %vm672_vm1, %v1364_v24, 0.0 }
 0x675   : > { %1366 = vadd.xlane.f32.xlu0 %v1365_v25 }
 0x6fe   : > { %v1367_v27 = vpop.xlane.xlu0 %1366 }
 0x6ff   : > { %v1368_v28 = vmul.f32 0.03125, %v1367_v27 }
 0x701   : > { %v1369_v29 = vadd.f32 1e-12, %v1368_v28 }
 0x703   : > { %2088 = vrsqrt.f32 %v1369_v29 }
 0x710   : > { %v2089_v11 = vpop.eup %2088 }
 0x711   : > { %v1371_v31 = vmul.f32 %v2089_v11, %v1363_v23 }
 0x713   : > { %v1378_v33 = vmul.f32 %v1779_v30, %v1371_v31 }
 0x715   : > { %v1385_v34 = vadd.f32 %v1780_v32, %v1378_v33 }
 0x717   : > { %v1386_v35 = vpack.c.bf16 %v1385_v34, %v1385_v34 }
 0x719   : > { %1908 = vmatmul.mubr.msk.bf16.vlgmr.msra.gmra.mxu1 %vm672_vm1, %v1386_v35 }
 0x7d9   : > { %v1447_v41 = vpop.f32.mrf.mxu1 }
 0x7da   : > { %v1448_v42 = vadd.f32 %v1781_v40, %v1447_v41 }
 0x7db   : > { %v1909_v43 = vpop.f32.mrf.mxu1 }
 0x7dc   : > { %v1454_v44 = vmul.f32 0.70710677, %v1448_v42  ;;  %v1453_v48 = vmul.f32 0.5, %v1448_v42 }
 0x7dd   : > { %v1450_v45 = vpop.f32.mrf.mxu1 }
 0x7de   : > { %2090 = verf.f32 %v1454_v44 }
 0x7df   : > { %v1910_v46 = vpop.f32.mrf.mxu1 }
 0x7eb   : > { %v2091_v47 = vpop.eup %2090 }
 0x7ec   : > { %v1456_v49 = vadd.f32 1.0, %v2091_v47 }
 0x7ee   : > { %v1457_v0 = vmul.f32 %v1456_v49, %v1453_v48 }
 0x7f0   : > { %v1458_v50 = vpack.c.bf16 %v1457_v0, %v1457_v0 }
 0x7f2   : > { %1920 = vmatmul.mubr.msk.bf16.vlgmr.msra.gmra.mxu0 %vm1498_vm7, %v1458_v50 }
 0x8b2   : > { %v1536_v52 = vpop.f32.mrf.mxu0 }
 0x8b3   : > { %v1537_v53 = vadd.f32 %v1785_v51, %v1536_v52 }
 0x8b4   : > { %v1921_v54 = vpop.f32.mrf.mxu0 }
 0x8b5   : > { %v1542_v55 = vadd.f32 %v1537_v53, %v1385_v34 }
 0x8b6   : > { %v1539_v56 = vpop.f32.mrf.mxu0 }
 0x8b7   : > { %v1545_v57 = vsel %vm672_vm1, %v1542_v55, 0.0 }
 0x8b8   : > { %1546 = vadd.xlane.f32.xlu0 %v1545_v57  ;;  %v1922_v58 = vpop.f32.mrf.mxu0 }
 0x941   : > { %v1547_v59 = vpop.xlane.xlu0 %1546 }
 0x942   : > { %v1548_v60 = vmul.f32 0.03125, %v1547_v59 }
 0x944   : > { %v1549_v61 = vsub.f32 %v1542_v55, %v1548_v60 }
 0x946   : > { %v1550_v62 = vmul.f32 %v1549_v61, %v1549_v61 }
 0x948   : > { %v1551_v63 = vsel %vm672_vm1, %v1550_v62, 0.0 }
 0x949   : > { %1552 = vadd.xlane.f32.xlu1 %v1551_v63 }
 0x9d2   : > { %v1553_v1 = vpop.xlane.xlu1 %1552 }
 0x9d3   : > { %v1554_v2 = vmul.f32 0.03125, %v1553_v1 }
 0x9d5   : > { %v1555_v4 = vadd.f32 1e-12, %v1554_v2 }
 0x9d7   : > { %2092 = vrsqrt.f32 %v1555_v4 }
 0x9e4   : > { %v2093_v5 = vpop.eup %2092 }
 0x9e5   : > { %v1557_v7 = vmul.f32 %v2093_v5, %v1549_v61 }
 0x9e7   : > { %v1564_v9 = vmul.f32 %v1791_v6, %v1557_v7 }
 0x9e9   : > { %v1571_v10 = vadd.f32 %v1792_v8, %v1564_v9 }
 0x9eb   : > { %v1572_v12 = vpack.c.bf16 %v1571_v10, %v1571_v10 }
 0x9ed   : > { %1574 = vst.msk [vmem:[%s637_s29] sm:$0xf] %vm1573_vm8, %v1572_v12 }
 0x9ee   : > { %2291 = shalt.err (!%p2288_p10)
}
 0x9ef   : > { %s2292_s19 = scalar_lea.hbm %s1588_s15, 64  ;;  %s2296_s8 = scalar_lea.hbm %s2906_s18, 128 }
 0x9f0   : > { %p2293_p0 = scmp.ne.s32.totalorder %s1588_s15, %s2292_s19  ;;  %p2297_p8 = scmp.lt.s32.totalorder %s1588_s15, %s2906_s18 }
 0x9f1   : > { %p2298_p12 = scmp.lt.s32.totalorder %s2296_s8, %s2292_s19 }
 0x9f2   : > { %p2294_p6 = pnand %p2293_p0, %p2610_p5 }
 0x9f3   : > { %p2299_p2 = por %p2298_p12, %p2297_p8 }
 0x9f4   : > { %p2295_p13 = pneg %p2294_p6 }
 0x9f6   : > { %p2300_p1 = pnand %p2299_p2, %p2295_p13 }
 0x9f8   : > { %2303 = shalt.err (!%p2300_p1)
}
 0x9f9   : > { %1949 = dma.vmem_to_hbm [thread:$0]  (%p2610_p5), %s1591_s17, 64, %s1588_s15, %s1576_s16  }
 0x9fa PF: > { %s1602_s29 = sand.u32 1, %s2350_s21   ;;  %p2907_p4 = scmp.ne.s32.totalorder %s2899_s3, 0 }
 0x9fb   : > { %p2908_p3 = scmp.ge.s32.totalorder %s2370_s26, 2  ;;  %s1603_s30 = scalar_lea.sflag [#allocation6], %s1602_s29 }
 0x9fd   : > { %p1975_p9 = pnand %p2908_p3, %p2907_p4 }
 0x9ff   : > { %p1976_p7 = pneg %p1975_p9 }
 0xa01   : > { %2345 = dma.done.wait (%p1976_p7), %s1603_s30, 64  }
 0xa02   : > { %2347 = vsyncadd (%p1976_p7), %s1603_s30, 4294967232  ;;  %s35_s26 = sadd.s32 1, %s2370_s26   ;;  %s2909_s20 = sld [smem:[#allocation22_spill]] }
 0xa03   : > { %p32_p11 = scmp.ge.s32.totalorder %s35_s26, 4   ;;  %s2910_s21 = smov %s2354_s22 }
 0xa04   : > { %s2911_s22 = smov %s2358_s23  ;;  %s2912_s23 = smov %s2615_s0 }
 0xa05   : > { %s2913_s24 = smov %s2366_s25  ;;  %34 = sbr.rel (!%p32_p11) target bundleno = 21 (0x15), region = 167 }
 0xa08   : > { %s2914_s25 = smov %s2909_s20 }
 0xa0a   :  { %1608 = vsyncpa [#allocation5], 1 }
 0xa0b   :  { %1610 = vsyncpa [#allocation5 + $0x1], 1 }
 0xa0c   :  { %1611 = vsyncpa [#allocation8], 1 }
 0xa0d   :  { %1612 = vsyncpa [#allocation11], 1 }
 0xa0e   :  { %1613 = vsyncpa [#allocation14], 1 }
 0xa0f   :  { %1614 = vsyncpa [#allocation6], 1 }
 0xa10   :  { %1616 = vsyncpa [#allocation6 + $0x1], 1 }

</bundles_post_ra>
